<compile_context>
chip_gen: v7x
topology: tpu7x:2x2x1
jax: 0.10.0
libtpu: 0.0.40
codegen_flags: <defaults>
</compile_context>

<pallas_src>
import functools

import jax
import jax.numpy as jnp
import numpy as np
from jax.experimental import pallas as pl
from jax.experimental.pallas import tpu as pltpu


_OFFSETS = [(dh, dw) for dh in (-1, 0, 1) for dw in (-1, 0, 1)]


def _round_up(x, m):
    return (x + m - 1) // m * m


# --------------------------------------------------------------------------
# pltpu.roll rotation-direction probe -- interpret mode only (no device
# compile / launch on the build path, works on CPU-only CI).  Falls back to
# the documented jnp.roll-compatible sign if the interpreter rejects roll.
# --------------------------------------------------------------------------
@functools.lru_cache(maxsize=None)
def _pltpu_roll_sign():
    def probe(x_ref, o_ref):
        o_ref[...] = pltpu.roll(x_ref[...], 1, 1)

    x = np.arange(8 * 128, dtype=np.float32).reshape(8, 128)
    try:
        out = np.asarray(
            pl.pallas_call(probe,
                           out_shape=jax.ShapeDtypeStruct((8, 128), jnp.float32),
                           interpret=True)(jnp.asarray(x)))
        if np.array_equal(out, np.roll(x, 1, axis=1)):
            return 1
        if np.array_equal(out, np.roll(x, -1, axis=1)):
            return -1
    except Exception:
        pass
    return 1        # pltpu.roll matches jnp.roll semantics


# --------------------------------------------------------------------------
# fused kernel: 3-layer conv+ReLU features for [input|target], pixel-L1,
# per-layer feature-L1 and gram-L1 partial sums -- all in one grid step.
# --------------------------------------------------------------------------
def _make_fused_kernel(H, W, n_layers, roll_sign):
    L = H * W
    lanes = 2 * L                           # [ input L | target L ]

    def kernel(x_ref, mask_ref, *rest):
        w_refs = rest[0:2 * n_layers:2]
        b_refs = rest[1:2 * n_layers:2]
        o_ref = rest[2 * n_layers]

        f = x_ref[0]                                        # (C0p, 2L) f32
        sums = [jnp.sum(jnp.abs(f[:, :L] - f[:, L:]))]      # pixel-L1 partial

        feat_sums, gram_sums = [], []
        for w_ref, b_ref in zip(w_refs, b_refs):
            # ---- 3x3 conv + ReLU on the fused [input|target] buffer -------
            # im2col in VMEM: 8 XLU rolls + boundary masks build the
            # (9*Cin, 2L) stack; one MXU matmul does the whole conv.
            parts = []
            for tap, (dh, dw) in enumerate(_OFFSETS):
                s = dh * W + dw                             # flattened shift
                if s == 0:
                    parts.append(f)                         # center tap
                else:
                    rolled = pltpu.roll(f, (roll_sign * (-s)) % lanes, 1)
                    parts.append(rolled * mask_ref[tap])    # zero OOB + seam
            stack = jnp.concatenate(parts, axis=0).astype(jnp.bfloat16)
            f = jnp.maximum(
                jnp.dot(w_ref[...].astype(jnp.bfloat16), stack,
                        preferred_element_type=jnp.float32) + b_ref[...],
                0.0)                                        # (Cout, 2L) f32

            # ---- per-layer loss partial sums -------------------------------
            feat_sums.append(jnp.sum(jnp.abs(f[:, :L] - f[:, L:])))
            fb = f.astype(jnp.bfloat16)
            gi = jax.lax.dot_general(fb[:, :L], fb[:, :L],
                                     (((1,), (1,)), ((), ())),
                                     preferred_element_type=jnp.float32)
            gt = jax.lax.dot_general(fb[:, L:], fb[:, L:],
                                     (((1,), (1,)), ((), ())),
                                     preferred_element_type=jnp.float32)
            gram_sums.append(jnp.sum(jnp.abs(gi - gt)))     # unscaled gram L1

        sums = sums + feat_sums + gram_sums                 # 1 + n + n scalars

        # One unmasked lane-dense (8,128) store per batch element:
        # loss scalar k lives in sublane-row k (host picks lane 0).
        row = jax.lax.broadcasted_iota(jnp.int32, (8, 128), 0)
        tile = jnp.zeros((8, 128), jnp.float32)
        for k, val in enumerate(sums):
            tile = jnp.where(row == k, val, tile)
        o_ref[0] = tile

    return kernel


# --------------------------------------------------------------------------
# wrapper: FeatureLoss.forward
# --------------------------------------------------------------------------
def build_feature_loss(params, wgts, img_shape):
    N, C0, H, W = img_shape
    L = H * W
    lanes = 2 * L
    n_layers = len(params)
    assert 1 + 2 * n_layers <= 8, "only 8 loss-slot rows reserved"
    out_chs = [int(w.shape[0]) for (w, _) in params]
    C0p = _round_up(C0, 8)                      # pad RGB to an 8-row sublane tile

    # ---- weights repacked for the im2col matmul -------------------------
    # stack row order is tap-major then channel, so w2d[co, tap*Cinp + ci].
    cins = [C0] + out_chs[:-1]
    cinps = [C0p] + out_chs[:-1]
    w2d, bs = [], []
    for (w, b), cin, cinp in zip(params, cins, cinps):
        wn = np.asarray(w, dtype=np.float32)          # (Cout, Cin, 3, 3)
        cout = wn.shape[0]
        wp = np.zeros((cout, cinp, 3, 3), np.float32)
        wp[:, :cin] = wn
        w2d.append(jnp.asarray(wp.transpose(0, 2, 3, 1).reshape(cout, 9 * cinp)))
        bs.append(jnp.asarray(np.asarray(b, np.float32).reshape(-1, 1)))

    # ---- boundary-validity masks, tiled over the two lane segments ------
    hh, ww = np.arange(L) // W, np.arange(L) % W
    mask_img = np.zeros((9, L), np.float32)
    for t, (dh, dw) in enumerate(_OFFSETS):
        mask_img[t] = ((hh + dh >= 0) & (hh + dh < H) &
                       (ww + dw >= 0) & (ww + dw < W)).astype(np.float32)
    mask_full = np.tile(mask_img, (1, 2))                        # (9, 2L)

    # The input||target lane concat is only valid because the masks zero every
    # lane whose rolled source would wrap across an image-segment boundary.
    seg = np.arange(lanes) // L
    for t, (dh, dw) in enumerate(_OFFSETS):
        s = dh * W + dw
        src = (np.arange(lanes) + s) % lanes
        assert not np.any(mask_full[t, seg != (src // L)]), "seam leak in mask"
    masks = jnp.asarray(mask_full.reshape(9, 1, lanes))

    kernel = _make_fused_kernel(H, W, n_layers, _pltpu_roll_sign())

    def full(shape):
        return pl.BlockSpec(shape, lambda b: (0,) * len(shape))

    in_specs = [pl.BlockSpec((1, C0p, lanes), lambda b: (b, 0, 0)),
                full(tuple(masks.shape))]
    flat_params = []
    for wm, bm in zip(w2d, bs):
        in_specs += [full(tuple(wm.shape)), full(tuple(bm.shape))]
        flat_params += [wm, bm]

    call = pl.pallas_call(
        kernel,
        grid=(N,),                                  # one step per image pair
        in_specs=in_specs,
        out_specs=pl.BlockSpec((1, 8, 128), lambda b: (b, 0, 0)),
        out_shape=jax.ShapeDtypeStruct((N, 8, 128), jnp.float32),
        compiler_params=pltpu.CompilerParams(
            dimension_semantics=("parallel",)),     # megacore-safe on v7x
    )
    # NOTE: per-step VMEM footprint here is <1 MiB so the default scoped VMEM
    # limit is left alone.  For real VGG-sized feature maps the L axis would be
    # chunked over a second "arbitrary" grid axis with the (C,C) grams and L1
    # partials held in VMEM scratch accumulators, sized so that 2 images x 2
    # pipeline buffers x (C, L_chunk) f32 stays well under v7x's 64 MiB VMEM.

    def loss_fn(inp, tgt):
        xs = inp.reshape(N, C0, L).astype(jnp.float32)     # pure reshape
        ts = tgt.reshape(N, C0, L).astype(jnp.float32)
        pad = ((0, 0), (0, C0p - C0), (0, 0))
        # channel-pad to 8 rows and concatenate input||target along lanes
        xcat = jnp.concatenate([jnp.pad(xs, pad), jnp.pad(ts, pad)], axis=-1)
        per_batch = call(xcat, masks, *flat_params)        # (N, 8, 128)
        sums = jnp.sum(per_batch[:, :, 0], axis=0)         # reduce batch partials

        total = sums[0] / (N * C0 * L)                     # pixel L1 mean
        for i, (c, wgt) in enumerate(zip(out_chs, wgts)):
            total = total + (sums[1 + i] / (N * c * L)) * wgt
            total = total + (sums[1 + n_layers + i] / (c * L) / (N * c * c)) \
                            * (wgt ** 2) * 5000.0
        return total

    return loss_fn


# --------------------------------------------------------------------------
# synthetic "m_feat" backbone
# TODO(synk): the real m_feat is a pretrained VGG-style module loaded from an
# external checkpoint (plus fastai hook_outputs); a deterministic 3-layer
# conv+ReLU stack stands in here, feeding the identical loss math.
# --------------------------------------------------------------------------
def init_params(key):
    shapes = [(8, 3, 3, 3), (16, 8, 3, 3), (16, 16, 3, 3)]
    params = []
    for shp in shapes:
        key, k1, k2 = jax.random.split(key, 3)
        fan_in = shp[1] * shp[2] * shp[3]
        w = jax.random.normal(k1, shp, jnp.float32) * (1.0 / np.sqrt(fan_in))
        b = jax.random.normal(k2, (shp[0],), jnp.float32) * 0.1
        params.append((w, b))
    return params


# --------------------------------------------------------------------------
# pure-JAX reference (same bf16-matmul / f32-accumulate policy as the kernel)
# --------------------------------------------------------------------------
def _ref_loss(inp, tgt, params, wgts):
    def conv(x, w, b):
        N, Cin, H, W = x.shape
        Cout = w.shape[0]
        xp = jnp.pad(x, ((0, 0), (0, 0), (1, 1), (1, 1)))
        cols = [xp[:, :, dh:dh + H, dw:dw + W] for dh in range(3) for dw in range(3)]
        patches = jnp.stack(cols, axis=-1)                          # (N,Cin,H,W,9)
        patches = patches.transpose(0, 2, 3, 1, 4).reshape(N * H * W, Cin * 9)
        wm = w.reshape(Cout, Cin * 9).T
        out = jnp.dot(patches.astype(jnp.bfloat16), wm.astype(jnp.bfloat16),
                      preferred_element_type=jnp.float32) + b
        out = jnp.maximum(out, 0.0)
        return out.reshape(N, H, W, Cout).transpose(0, 3, 1, 2)

    def feats(x):
        fs, h = [], x
        for w, b in params:
            h = conv(h, w, b)
            fs.append(h)
        return fs

    def l1(a, b):
        return jnp.mean(jnp.abs(a - b))

    def gram(x):
        n, c, hh, ww = x.shape
        xm = x.reshape(n, c, hh * ww).astype(jnp.bfloat16)
        g = jnp.einsum('ncl,ndl->ncd', xm, xm, preferred_element_type=jnp.float32)
        return g / (c * hh * ww)

    fin, fout = feats(inp), feats(tgt)
    ls = [l1(inp, tgt)]
    ls += [l1(a, b) * w for a, b, w in zip(fin, fout, wgts)]
    ls += [l1(gram(a), gram(b)) * w ** 2 * 5000.0 for a, b, w in zip(fin, fout, wgts)]
    return sum(ls)


# --------------------------------------------------------------------------
if __name__ == "__main__":
    key = jax.random.PRNGKey(0)
    kp, ki, kt = jax.random.split(key, 3)

    params = init_params(kp)
    wgts = [5.0, 15.0, 2.0]                       # fastai-style layer weights

    x_in = jax.random.uniform(ki, (2, 3, 16, 16), jnp.float32)
    x_tgt = jax.random.uniform(kt, (2, 3, 16, 16), jnp.float32)

    loss_fn = jax.jit(build_feature_loss(params, wgts, x_in.shape))
    loss = loss_fn(x_in, x_tgt)
    jax.block_until_ready(loss)

    ref = _ref_loss(x_in, x_tgt, params, wgts)
    np.testing.assert_allclose(np.asarray(loss), np.asarray(ref),
                               rtol=1e-2, atol=1e-3)

    print("KERNEL_OK")
</pallas_src>

<mosaic_0001>
module attributes {stable_mosaic.version = 11 : i64} {
  func.func @kernel(%arg0: i32, %arg1: memref<1x8x512xf32, #tpu.memory_space<vmem>>, %arg2: memref<9x1x512xf32, #tpu.memory_space<vmem>>, %arg3: memref<8x72xf32, #tpu.memory_space<vmem>>, %arg4: memref<8x1xf32, #tpu.memory_space<vmem>>, %arg5: memref<16x72xf32, #tpu.memory_space<vmem>>, %arg6: memref<16x1xf32, #tpu.memory_space<vmem>>, %arg7: memref<16x144xf32, #tpu.memory_space<vmem>>, %arg8: memref<16x1xf32, #tpu.memory_space<vmem>>, %arg9: memref<1x8x128xf32, #tpu.memory_space<vmem>>) attributes {dimension_semantics = [#tpu.dimension_semantics<parallel>], iteration_bounds = array<i64: 2>, scalar_prefetch = 0 : i64, scratch_operands = 0 : i64, tpu.core_type = #tpu.core_type<tc>, window_params = [{transform_indices = @transform_0, window_bounds = array<i64: 1, 8, 512>}, {pipeline_mode = #tpu.pipeline_mode<synchronous>, transform_indices = @transform_1, window_bounds = array<i64: 9, 1, 512>}, {pipeline_mode = #tpu.pipeline_mode<synchronous>, transform_indices = @transform_2, window_bounds = array<i64: 8, 72>}, {pipeline_mode = #tpu.pipeline_mode<synchronous>, transform_indices = @transform_3, window_bounds = array<i64: 8, 1>}, {pipeline_mode = #tpu.pipeline_mode<synchronous>, transform_indices = @transform_4, window_bounds = array<i64: 16, 72>}, {pipeline_mode = #tpu.pipeline_mode<synchronous>, transform_indices = @transform_5, window_bounds = array<i64: 16, 1>}, {pipeline_mode = #tpu.pipeline_mode<synchronous>, transform_indices = @transform_6, window_bounds = array<i64: 16, 144>}, {pipeline_mode = #tpu.pipeline_mode<synchronous>, transform_indices = @transform_7, window_bounds = array<i64: 16, 1>}, {transform_indices = @transform_8, window_bounds = array<i64: 1, 8, 128>}]} {
    %c0 = arith.constant 0 : index
    %c0_0 = arith.constant 0 : index
    %c0_1 = arith.constant 0 : index
    %0 = vector.load %arg1[%c0, %c0_0, %c0_1] : memref<1x8x512xf32, #tpu.memory_space<vmem>>, vector<1x8x512xf32>
    %1 = vector.shape_cast %0 : vector<1x8x512xf32> to vector<8x512xf32>
    %2 = vector.extract_strided_slice %1 {offsets = [0, 0], sizes = [8, 256], strides = [1, 1]} : vector<8x512xf32> to vector<8x256xf32>
    %3 = vector.extract_strided_slice %1 {offsets = [0, 256], sizes = [8, 256], strides = [1, 1]} : vector<8x512xf32> to vector<8x256xf32>
    %4 = arith.subf %2, %3 : vector<8x256xf32>
    %5 = math.absf %4 : vector<8x256xf32>
    %6 = vector.shape_cast %5 : vector<8x256xf32> to vector<1x8x256xf32>
    %cst = arith.constant dense<0.000000e+00> : vector<1xf32>
    %7 = vector.multi_reduction <add>, %6, %cst [1, 2] : vector<1x8x256xf32> to vector<1xf32>
    %8 = vector.shape_cast %7 : vector<1xf32> to vector<1x1x1xf32>
    %9 = vector.extract %8[0, 0, 0] : f32 from vector<1x1x1xf32>
    %c17_i32 = arith.constant 17 : i32
    %10 = tpu.dynamic_rotate %1 by %c17_i32 dim 1 : vector<8x512xf32>, i32 -> vector<8x512xf32>
    %c0_2 = arith.constant 0 : index
    %c0_3 = arith.constant 0 : index
    %c0_4 = arith.constant 0 : index
    %11 = vector.load %arg2[%c0_2, %c0_3, %c0_4] : memref<9x1x512xf32, #tpu.memory_space<vmem>>, vector<1x1x512xf32>
    %12 = vector.shape_cast %11 : vector<1x1x512xf32> to vector<1x512xf32>
    %13 = vector.broadcast %12 : vector<1x512xf32> to vector<8x512xf32>
    %14 = arith.mulf %10, %13 : vector<8x512xf32>
    %c16_i32 = arith.constant 16 : i32
    %15 = tpu.dynamic_rotate %1 by %c16_i32 dim 1 : vector<8x512xf32>, i32 -> vector<8x512xf32>
    %c1 = arith.constant 1 : index
    %c0_5 = arith.constant 0 : index
    %c0_6 = arith.constant 0 : index
    %16 = vector.load %arg2[%c1, %c0_5, %c0_6] : memref<9x1x512xf32, #tpu.memory_space<vmem>>, vector<1x1x512xf32>
    %17 = vector.shape_cast %16 : vector<1x1x512xf32> to vector<1x512xf32>
    %18 = vector.broadcast %17 : vector<1x512xf32> to vector<8x512xf32>
    %19 = arith.mulf %15, %18 : vector<8x512xf32>
    %c15_i32 = arith.constant 15 : i32
    %20 = tpu.dynamic_rotate %1 by %c15_i32 dim 1 : vector<8x512xf32>, i32 -> vector<8x512xf32>
    %c2 = arith.constant 2 : index
    %c0_7 = arith.constant 0 : index
    %c0_8 = arith.constant 0 : index
    %21 = vector.load %arg2[%c2, %c0_7, %c0_8] : memref<9x1x512xf32, #tpu.memory_space<vmem>>, vector<1x1x512xf32>
    %22 = vector.shape_cast %21 : vector<1x1x512xf32> to vector<1x512xf32>
    %23 = vector.broadcast %22 : vector<1x512xf32> to vector<8x512xf32>
    %24 = arith.mulf %20, %23 : vector<8x512xf32>
    %c1_i32 = arith.constant 1 : i32
    %25 = tpu.dynamic_rotate %1 by %c1_i32 dim 1 : vector<8x512xf32>, i32 -> vector<8x512xf32>
    %c3 = arith.constant 3 : index
    %c0_9 = arith.constant 0 : index
    %c0_10 = arith.constant 0 : index
    %26 = vector.load %arg2[%c3, %c0_9, %c0_10] : memref<9x1x512xf32, #tpu.memory_space<vmem>>, vector<1x1x512xf32>
    %27 = vector.shape_cast %26 : vector<1x1x512xf32> to vector<1x512xf32>
    %28 = vector.broadcast %27 : vector<1x512xf32> to vector<8x512xf32>
    %29 = arith.mulf %25, %28 : vector<8x512xf32>
    %c511_i32 = arith.constant 511 : i32
    %30 = tpu.dynamic_rotate %1 by %c511_i32 dim 1 : vector<8x512xf32>, i32 -> vector<8x512xf32>
    %c5 = arith.constant 5 : index
    %c0_11 = arith.constant 0 : index
    %c0_12 = arith.constant 0 : index
    %31 = vector.load %arg2[%c5, %c0_11, %c0_12] : memref<9x1x512xf32, #tpu.memory_space<vmem>>, vector<1x1x512xf32>
    %32 = vector.shape_cast %31 : vector<1x1x512xf32> to vector<1x512xf32>
    %33 = vector.broadcast %32 : vector<1x512xf32> to vector<8x512xf32>
    %34 = arith.mulf %30, %33 : vector<8x512xf32>
    %c497_i32 = arith.constant 497 : i32
    %35 = tpu.dynamic_rotate %1 by %c497_i32 dim 1 : vector<8x512xf32>, i32 -> vector<8x512xf32>
    %c6 = arith.constant 6 : index
    %c0_13 = arith.constant 0 : index
    %c0_14 = arith.constant 0 : index
    %36 = vector.load %arg2[%c6, %c0_13, %c0_14] : memref<9x1x512xf32, #tpu.memory_space<vmem>>, vector<1x1x512xf32>
    %37 = vector.shape_cast %36 : vector<1x1x512xf32> to vector<1x512xf32>
    %38 = vector.broadcast %37 : vector<1x512xf32> to vector<8x512xf32>
    %39 = arith.mulf %35, %38 : vector<8x512xf32>
    %c496_i32 = arith.constant 496 : i32
    %40 = tpu.dynamic_rotate %1 by %c496_i32 dim 1 : vector<8x512xf32>, i32 -> vector<8x512xf32>
    %c7 = arith.constant 7 : index
    %c0_15 = arith.constant 0 : index
    %c0_16 = arith.constant 0 : index
    %41 = vector.load %arg2[%c7, %c0_15, %c0_16] : memref<9x1x512xf32, #tpu.memory_space<vmem>>, vector<1x1x512xf32>
    %42 = vector.shape_cast %41 : vector<1x1x512xf32> to vector<1x512xf32>
    %43 = vector.broadcast %42 : vector<1x512xf32> to vector<8x512xf32>
    %44 = arith.mulf %40, %43 : vector<8x512xf32>
    %c495_i32 = arith.constant 495 : i32
    %45 = tpu.dynamic_rotate %1 by %c495_i32 dim 1 : vector<8x512xf32>, i32 -> vector<8x512xf32>
    %c8 = arith.constant 8 : index
    %c0_17 = arith.constant 0 : index
    %c0_18 = arith.constant 0 : index
    %46 = vector.load %arg2[%c8, %c0_17, %c0_18] : memref<9x1x512xf32, #tpu.memory_space<vmem>>, vector<1x1x512xf32>
    %47 = vector.shape_cast %46 : vector<1x1x512xf32> to vector<1x512xf32>
    %48 = vector.broadcast %47 : vector<1x512xf32> to vector<8x512xf32>
    %49 = arith.mulf %45, %48 : vector<8x512xf32>
    %50 = tpu.concatenate %14, %19, %24, %29, %1, %34, %39, %44, %49 in 0 : vector<8x512xf32>, vector<8x512xf32>, vector<8x512xf32>, vector<8x512xf32>, vector<8x512xf32>, vector<8x512xf32>, vector<8x512xf32>, vector<8x512xf32>, vector<8x512xf32> -> vector<72x512xf32>
    %51 = arith.truncf %50 : vector<72x512xf32> to vector<72x512xbf16>
    %c0_19 = arith.constant 0 : index
    %c0_20 = arith.constant 0 : index
    %52 = vector.load %arg3[%c0_19, %c0_20] : memref<8x72xf32, #tpu.memory_space<vmem>>, vector<8x72xf32>
    %53 = arith.truncf %52 : vector<8x72xf32> to vector<8x72xbf16>
    %cst_21 = arith.constant dense<0.000000e+00> : vector<8x512xf32>
    %54 = tpu.matmul %53, %51, %cst_21 {dimension_numbers = #tpu.dot_dimension_numbers<[1], [0], [0], [1], [0, 0, 1, 1], [], []>} : vector<8x72xbf16>, vector<72x512xbf16>, vector<8x512xf32> -> vector<8x512xf32>
    %c0_22 = arith.constant 0 : index
    %c0_23 = arith.constant 0 : index
    %55 = vector.load %arg4[%c0_22, %c0_23] : memref<8x1xf32, #tpu.memory_space<vmem>>, vector<8x1xf32>
    %56 = vector.broadcast %55 : vector<8x1xf32> to vector<8x512xf32>
    %57 = arith.addf %54, %56 : vector<8x512xf32>
    %cst_24 = arith.constant 0.000000e+00 : f32
    %58 = vector.broadcast %cst_24 : f32 to vector<8x512xf32>
    %59 = arith.maximumf %57, %58 : vector<8x512xf32>
    %60 = vector.extract_strided_slice %59 {offsets = [0, 0], sizes = [8, 256], strides = [1, 1]} : vector<8x512xf32> to vector<8x256xf32>
    %61 = vector.extract_strided_slice %59 {offsets = [0, 256], sizes = [8, 256], strides = [1, 1]} : vector<8x512xf32> to vector<8x256xf32>
    %62 = arith.subf %60, %61 : vector<8x256xf32>
    %63 = math.absf %62 : vector<8x256xf32>
    %64 = vector.shape_cast %63 : vector<8x256xf32> to vector<1x8x256xf32>
    %cst_25 = arith.constant dense<0.000000e+00> : vector<1xf32>
    %65 = vector.multi_reduction <add>, %64, %cst_25 [1, 2] : vector<1x8x256xf32> to vector<1xf32>
    %66 = vector.shape_cast %65 : vector<1xf32> to vector<1x1x1xf32>
    %67 = vector.extract %66[0, 0, 0] : f32 from vector<1x1x1xf32>
    %68 = arith.truncf %59 : vector<8x512xf32> to vector<8x512xbf16>
    %69 = vector.extract_strided_slice %68 {offsets = [0, 0], sizes = [8, 256], strides = [1, 1]} : vector<8x512xbf16> to vector<8x256xbf16>
    %70 = vector.extract_strided_slice %68 {offsets = [0, 0], sizes = [8, 256], strides = [1, 1]} : vector<8x512xbf16> to vector<8x256xbf16>
    %cst_26 = arith.constant dense<0.000000e+00> : vector<8x8xf32>
    %71 = tpu.matmul %69, %70, %cst_26 {dimension_numbers = #tpu.dot_dimension_numbers<[1], [1], [0], [0], [0, 0, 1, 0], [], []>} : vector<8x256xbf16>, vector<8x256xbf16>, vector<8x8xf32> -> vector<8x8xf32>
    %72 = vector.extract_strided_slice %68 {offsets = [0, 256], sizes = [8, 256], strides = [1, 1]} : vector<8x512xbf16> to vector<8x256xbf16>
    %73 = vector.extract_strided_slice %68 {offsets = [0, 256], sizes = [8, 256], strides = [1, 1]} : vector<8x512xbf16> to vector<8x256xbf16>
    %cst_27 = arith.constant dense<0.000000e+00> : vector<8x8xf32>
    %74 = tpu.matmul %72, %73, %cst_27 {dimension_numbers = #tpu.dot_dimension_numbers<[1], [1], [0], [0], [0, 0, 1, 0], [], []>} : vector<8x256xbf16>, vector<8x256xbf16>, vector<8x8xf32> -> vector<8x8xf32>
    %75 = arith.subf %71, %74 : vector<8x8xf32>
    %76 = math.absf %75 : vector<8x8xf32>
    %77 = vector.shape_cast %76 : vector<8x8xf32> to vector<1x8x8xf32>
    %cst_28 = arith.constant dense<0.000000e+00> : vector<1xf32>
    %78 = vector.multi_reduction <add>, %77, %cst_28 [1, 2] : vector<1x8x8xf32> to vector<1xf32>
    %79 = vector.shape_cast %78 : vector<1xf32> to vector<1x1x1xf32>
    %80 = vector.extract %79[0, 0, 0] : f32 from vector<1x1x1xf32>
    %c17_i32_29 = arith.constant 17 : i32
    %81 = tpu.dynamic_rotate %59 by %c17_i32_29 dim 1 : vector<8x512xf32>, i32 -> vector<8x512xf32>
    %c0_30 = arith.constant 0 : index
    %c0_31 = arith.constant 0 : index
    %c0_32 = arith.constant 0 : index
    %82 = vector.load %arg2[%c0_30, %c0_31, %c0_32] : memref<9x1x512xf32, #tpu.memory_space<vmem>>, vector<1x1x512xf32>
    %83 = vector.shape_cast %82 : vector<1x1x512xf32> to vector<1x512xf32>
    %84 = vector.broadcast %83 : vector<1x512xf32> to vector<8x512xf32>
    %85 = arith.mulf %81, %84 : vector<8x512xf32>
    %c16_i32_33 = arith.constant 16 : i32
    %86 = tpu.dynamic_rotate %59 by %c16_i32_33 dim 1 : vector<8x512xf32>, i32 -> vector<8x512xf32>
    %c1_34 = arith.constant 1 : index
    %c0_35 = arith.constant 0 : index
    %c0_36 = arith.constant 0 : index
    %87 = vector.load %arg2[%c1_34, %c0_35, %c0_36] : memref<9x1x512xf32, #tpu.memory_space<vmem>>, vector<1x1x512xf32>
    %88 = vector.shape_cast %87 : vector<1x1x512xf32> to vector<1x512xf32>
    %89 = vector.broadcast %88 : vector<1x512xf32> to vector<8x512xf32>
    %90 = arith.mulf %86, %89 : vector<8x512xf32>
    %c15_i32_37 = arith.constant 15 : i32
    %91 = tpu.dynamic_rotate %59 by %c15_i32_37 dim 1 : vector<8x512xf32>, i32 -> vector<8x512xf32>
    %c2_38 = arith.constant 2 : index
    %c0_39 = arith.constant 0 : index
    %c0_40 = arith.constant 0 : index
    %92 = vector.load %arg2[%c2_38, %c0_39, %c0_40] : memref<9x1x512xf32, #tpu.memory_space<vmem>>, vector<1x1x512xf32>
    %93 = vector.shape_cast %92 : vector<1x1x512xf32> to vector<1x512xf32>
    %94 = vector.broadcast %93 : vector<1x512xf32> to vector<8x512xf32>
    %95 = arith.mulf %91, %94 : vector<8x512xf32>
    %c1_i32_41 = arith.constant 1 : i32
    %96 = tpu.dynamic_rotate %59 by %c1_i32_41 dim 1 : vector<8x512xf32>, i32 -> vector<8x512xf32>
    %c3_42 = arith.constant 3 : index
    %c0_43 = arith.constant 0 : index
    %c0_44 = arith.constant 0 : index
    %97 = vector.load %arg2[%c3_42, %c0_43, %c0_44] : memref<9x1x512xf32, #tpu.memory_space<vmem>>, vector<1x1x512xf32>
    %98 = vector.shape_cast %97 : vector<1x1x512xf32> to vector<1x512xf32>
    %99 = vector.broadcast %98 : vector<1x512xf32> to vector<8x512xf32>
    %100 = arith.mulf %96, %99 : vector<8x512xf32>
    %c511_i32_45 = arith.constant 511 : i32
    %101 = tpu.dynamic_rotate %59 by %c511_i32_45 dim 1 : vector<8x512xf32>, i32 -> vector<8x512xf32>
    %c5_46 = arith.constant 5 : index
    %c0_47 = arith.constant 0 : index
    %c0_48 = arith.constant 0 : index
    %102 = vector.load %arg2[%c5_46, %c0_47, %c0_48] : memref<9x1x512xf32, #tpu.memory_space<vmem>>, vector<1x1x512xf32>
    %103 = vector.shape_cast %102 : vector<1x1x512xf32> to vector<1x512xf32>
    %104 = vector.broadcast %103 : vector<1x512xf32> to vector<8x512xf32>
    %105 = arith.mulf %101, %104 : vector<8x512xf32>
    %c497_i32_49 = arith.constant 497 : i32
    %106 = tpu.dynamic_rotate %59 by %c497_i32_49 dim 1 : vector<8x512xf32>, i32 -> vector<8x512xf32>
    %c6_50 = arith.constant 6 : index
    %c0_51 = arith.constant 0 : index
    %c0_52 = arith.constant 0 : index
    %107 = vector.load %arg2[%c6_50, %c0_51, %c0_52] : memref<9x1x512xf32, #tpu.memory_space<vmem>>, vector<1x1x512xf32>
    %108 = vector.shape_cast %107 : vector<1x1x512xf32> to vector<1x512xf32>
    %109 = vector.broadcast %108 : vector<1x512xf32> to vector<8x512xf32>
    %110 = arith.mulf %106, %109 : vector<8x512xf32>
    %c496_i32_53 = arith.constant 496 : i32
    %111 = tpu.dynamic_rotate %59 by %c496_i32_53 dim 1 : vector<8x512xf32>, i32 -> vector<8x512xf32>
    %c7_54 = arith.constant 7 : index
    %c0_55 = arith.constant 0 : index
    %c0_56 = arith.constant 0 : index
    %112 = vector.load %arg2[%c7_54, %c0_55, %c0_56] : memref<9x1x512xf32, #tpu.memory_space<vmem>>, vector<1x1x512xf32>
    %113 = vector.shape_cast %112 : vector<1x1x512xf32> to vector<1x512xf32>
    %114 = vector.broadcast %113 : vector<1x512xf32> to vector<8x512xf32>
    %115 = arith.mulf %111, %114 : vector<8x512xf32>
    %c495_i32_57 = arith.constant 495 : i32
    %116 = tpu.dynamic_rotate %59 by %c495_i32_57 dim 1 : vector<8x512xf32>, i32 -> vector<8x512xf32>
    %c8_58 = arith.constant 8 : index
    %c0_59 = arith.constant 0 : index
    %c0_60 = arith.constant 0 : index
    %117 = vector.load %arg2[%c8_58, %c0_59, %c0_60] : memref<9x1x512xf32, #tpu.memory_space<vmem>>, vector<1x1x512xf32>
    %118 = vector.shape_cast %117 : vector<1x1x512xf32> to vector<1x512xf32>
    %119 = vector.broadcast %118 : vector<1x512xf32> to vector<8x512xf32>
    %120 = arith.mulf %116, %119 : vector<8x512xf32>
    %121 = tpu.concatenate %85, %90, %95, %100, %59, %105, %110, %115, %120 in 0 : vector<8x512xf32>, vector<8x512xf32>, vector<8x512xf32>, vector<8x512xf32>, vector<8x512xf32>, vector<8x512xf32>, vector<8x512xf32>, vector<8x512xf32>, vector<8x512xf32> -> vector<72x512xf32>
    %122 = arith.truncf %121 : vector<72x512xf32> to vector<72x512xbf16>
    %c0_61 = arith.constant 0 : index
    %c0_62 = arith.constant 0 : index
    %123 = vector.load %arg5[%c0_61, %c0_62] : memref<16x72xf32, #tpu.memory_space<vmem>>, vector<16x72xf32>
    %124 = arith.truncf %123 : vector<16x72xf32> to vector<16x72xbf16>
    %cst_63 = arith.constant dense<0.000000e+00> : vector<16x512xf32>
    %125 = tpu.matmul %124, %122, %cst_63 {dimension_numbers = #tpu.dot_dimension_numbers<[1], [0], [0], [1], [0, 0, 1, 1], [], []>} : vector<16x72xbf16>, vector<72x512xbf16>, vector<16x512xf32> -> vector<16x512xf32>
    %c0_64 = arith.constant 0 : index
    %c0_65 = arith.constant 0 : index
    %126 = vector.load %arg6[%c0_64, %c0_65] : memref<16x1xf32, #tpu.memory_space<vmem>>, vector<16x1xf32>
    %127 = vector.broadcast %126 : vector<16x1xf32> to vector<16x512xf32>
    %128 = arith.addf %125, %127 : vector<16x512xf32>
    %cst_66 = arith.constant 0.000000e+00 : f32
    %129 = vector.broadcast %cst_66 : f32 to vector<16x512xf32>
    %130 = arith.maximumf %128, %129 : vector<16x512xf32>
    %131 = vector.extract_strided_slice %130 {offsets = [0, 0], sizes = [16, 256], strides = [1, 1]} : vector<16x512xf32> to vector<16x256xf32>
    %132 = vector.extract_strided_slice %130 {offsets = [0, 256], sizes = [16, 256], strides = [1, 1]} : vector<16x512xf32> to vector<16x256xf32>
    %133 = arith.subf %131, %132 : vector<16x256xf32>
    %134 = math.absf %133 : vector<16x256xf32>
    %135 = vector.shape_cast %134 : vector<16x256xf32> to vector<1x16x256xf32>
    %cst_67 = arith.constant dense<0.000000e+00> : vector<1xf32>
    %136 = vector.multi_reduction <add>, %135, %cst_67 [1, 2] : vector<1x16x256xf32> to vector<1xf32>
    %137 = vector.shape_cast %136 : vector<1xf32> to vector<1x1x1xf32>
    %138 = vector.extract %137[0, 0, 0] : f32 from vector<1x1x1xf32>
    %139 = arith.truncf %130 : vector<16x512xf32> to vector<16x512xbf16>
    %140 = vector.extract_strided_slice %139 {offsets = [0, 0], sizes = [16, 256], strides = [1, 1]} : vector<16x512xbf16> to vector<16x256xbf16>
    %141 = vector.extract_strided_slice %139 {offsets = [0, 0], sizes = [16, 256], strides = [1, 1]} : vector<16x512xbf16> to vector<16x256xbf16>
    %cst_68 = arith.constant dense<0.000000e+00> : vector<16x16xf32>
    %142 = tpu.matmul %140, %141, %cst_68 {dimension_numbers = #tpu.dot_dimension_numbers<[1], [1], [0], [0], [0, 0, 1, 0], [], []>} : vector<16x256xbf16>, vector<16x256xbf16>, vector<16x16xf32> -> vector<16x16xf32>
    %143 = vector.extract_strided_slice %139 {offsets = [0, 256], sizes = [16, 256], strides = [1, 1]} : vector<16x512xbf16> to vector<16x256xbf16>
    %144 = vector.extract_strided_slice %139 {offsets = [0, 256], sizes = [16, 256], strides = [1, 1]} : vector<16x512xbf16> to vector<16x256xbf16>
    %cst_69 = arith.constant dense<0.000000e+00> : vector<16x16xf32>
    %145 = tpu.matmul %143, %144, %cst_69 {dimension_numbers = #tpu.dot_dimension_numbers<[1], [1], [0], [0], [0, 0, 1, 0], [], []>} : vector<16x256xbf16>, vector<16x256xbf16>, vector<16x16xf32> -> vector<16x16xf32>
    %146 = arith.subf %142, %145 : vector<16x16xf32>
    %147 = math.absf %146 : vector<16x16xf32>
    %148 = vector.shape_cast %147 : vector<16x16xf32> to vector<1x16x16xf32>
    %cst_70 = arith.constant dense<0.000000e+00> : vector<1xf32>
    %149 = vector.multi_reduction <add>, %148, %cst_70 [1, 2] : vector<1x16x16xf32> to vector<1xf32>
    %150 = vector.shape_cast %149 : vector<1xf32> to vector<1x1x1xf32>
    %151 = vector.extract %150[0, 0, 0] : f32 from vector<1x1x1xf32>
    %c17_i32_71 = arith.constant 17 : i32
    %152 = tpu.dynamic_rotate %130 by %c17_i32_71 dim 1 : vector<16x512xf32>, i32 -> vector<16x512xf32>
    %c0_72 = arith.constant 0 : index
    %c0_73 = arith.constant 0 : index
    %c0_74 = arith.constant 0 : index
    %153 = vector.load %arg2[%c0_72, %c0_73, %c0_74] : memref<9x1x512xf32, #tpu.memory_space<vmem>>, vector<1x1x512xf32>
    %154 = vector.shape_cast %153 : vector<1x1x512xf32> to vector<1x512xf32>
    %155 = vector.broadcast %154 : vector<1x512xf32> to vector<16x512xf32>
    %156 = arith.mulf %152, %155 : vector<16x512xf32>
    %c16_i32_75 = arith.constant 16 : i32
    %157 = tpu.dynamic_rotate %130 by %c16_i32_75 dim 1 : vector<16x512xf32>, i32 -> vector<16x512xf32>
    %c1_76 = arith.constant 1 : index
    %c0_77 = arith.constant 0 : index
    %c0_78 = arith.constant 0 : index
    %158 = vector.load %arg2[%c1_76, %c0_77, %c0_78] : memref<9x1x512xf32, #tpu.memory_space<vmem>>, vector<1x1x512xf32>
    %159 = vector.shape_cast %158 : vector<1x1x512xf32> to vector<1x512xf32>
    %160 = vector.broadcast %159 : vector<1x512xf32> to vector<16x512xf32>
    %161 = arith.mulf %157, %160 : vector<16x512xf32>
    %c15_i32_79 = arith.constant 15 : i32
    %162 = tpu.dynamic_rotate %130 by %c15_i32_79 dim 1 : vector<16x512xf32>, i32 -> vector<16x512xf32>
    %c2_80 = arith.constant 2 : index
    %c0_81 = arith.constant 0 : index
    %c0_82 = arith.constant 0 : index
    %163 = vector.load %arg2[%c2_80, %c0_81, %c0_82] : memref<9x1x512xf32, #tpu.memory_space<vmem>>, vector<1x1x512xf32>
    %164 = vector.shape_cast %163 : vector<1x1x512xf32> to vector<1x512xf32>
    %165 = vector.broadcast %164 : vector<1x512xf32> to vector<16x512xf32>
    %166 = arith.mulf %162, %165 : vector<16x512xf32>
    %c1_i32_83 = arith.constant 1 : i32
    %167 = tpu.dynamic_rotate %130 by %c1_i32_83 dim 1 : vector<16x512xf32>, i32 -> vector<16x512xf32>
    %c3_84 = arith.constant 3 : index
    %c0_85 = arith.constant 0 : index
    %c0_86 = arith.constant 0 : index
    %168 = vector.load %arg2[%c3_84, %c0_85, %c0_86] : memref<9x1x512xf32, #tpu.memory_space<vmem>>, vector<1x1x512xf32>
    %169 = vector.shape_cast %168 : vector<1x1x512xf32> to vector<1x512xf32>
    %170 = vector.broadcast %169 : vector<1x512xf32> to vector<16x512xf32>
    %171 = arith.mulf %167, %170 : vector<16x512xf32>
    %c511_i32_87 = arith.constant 511 : i32
    %172 = tpu.dynamic_rotate %130 by %c511_i32_87 dim 1 : vector<16x512xf32>, i32 -> vector<16x512xf32>
    %c5_88 = arith.constant 5 : index
    %c0_89 = arith.constant 0 : index
    %c0_90 = arith.constant 0 : index
    %173 = vector.load %arg2[%c5_88, %c0_89, %c0_90] : memref<9x1x512xf32, #tpu.memory_space<vmem>>, vector<1x1x512xf32>
    %174 = vector.shape_cast %173 : vector<1x1x512xf32> to vector<1x512xf32>
    %175 = vector.broadcast %174 : vector<1x512xf32> to vector<16x512xf32>
    %176 = arith.mulf %172, %175 : vector<16x512xf32>
    %c497_i32_91 = arith.constant 497 : i32
    %177 = tpu.dynamic_rotate %130 by %c497_i32_91 dim 1 : vector<16x512xf32>, i32 -> vector<16x512xf32>
    %c6_92 = arith.constant 6 : index
    %c0_93 = arith.constant 0 : index
    %c0_94 = arith.constant 0 : index
    %178 = vector.load %arg2[%c6_92, %c0_93, %c0_94] : memref<9x1x512xf32, #tpu.memory_space<vmem>>, vector<1x1x512xf32>
    %179 = vector.shape_cast %178 : vector<1x1x512xf32> to vector<1x512xf32>
    %180 = vector.broadcast %179 : vector<1x512xf32> to vector<16x512xf32>
    %181 = arith.mulf %177, %180 : vector<16x512xf32>
    %c496_i32_95 = arith.constant 496 : i32
    %182 = tpu.dynamic_rotate %130 by %c496_i32_95 dim 1 : vector<16x512xf32>, i32 -> vector<16x512xf32>
    %c7_96 = arith.constant 7 : index
    %c0_97 = arith.constant 0 : index
    %c0_98 = arith.constant 0 : index
    %183 = vector.load %arg2[%c7_96, %c0_97, %c0_98] : memref<9x1x512xf32, #tpu.memory_space<vmem>>, vector<1x1x512xf32>
    %184 = vector.shape_cast %183 : vector<1x1x512xf32> to vector<1x512xf32>
    %185 = vector.broadcast %184 : vector<1x512xf32> to vector<16x512xf32>
    %186 = arith.mulf %182, %185 : vector<16x512xf32>
    %c495_i32_99 = arith.constant 495 : i32
    %187 = tpu.dynamic_rotate %130 by %c495_i32_99 dim 1 : vector<16x512xf32>, i32 -> vector<16x512xf32>
    %c8_100 = arith.constant 8 : index
    %c0_101 = arith.constant 0 : index
    %c0_102 = arith.constant 0 : index
    %188 = vector.load %arg2[%c8_100, %c0_101, %c0_102] : memref<9x1x512xf32, #tpu.memory_space<vmem>>, vector<1x1x512xf32>
    %189 = vector.shape_cast %188 : vector<1x1x512xf32> to vector<1x512xf32>
    %190 = vector.broadcast %189 : vector<1x512xf32> to vector<16x512xf32>
    %191 = arith.mulf %187, %190 : vector<16x512xf32>
    %192 = tpu.concatenate %156, %161, %166, %171, %130, %176, %181, %186, %191 in 0 : vector<16x512xf32>, vector<16x512xf32>, vector<16x512xf32>, vector<16x512xf32>, vector<16x512xf32>, vector<16x512xf32>, vector<16x512xf32>, vector<16x512xf32>, vector<16x512xf32> -> vector<144x512xf32>
    %193 = arith.truncf %192 : vector<144x512xf32> to vector<144x512xbf16>
    %c0_103 = arith.constant 0 : index
    %c0_104 = arith.constant 0 : index
    %194 = vector.load %arg7[%c0_103, %c0_104] : memref<16x144xf32, #tpu.memory_space<vmem>>, vector<16x144xf32>
    %195 = arith.truncf %194 : vector<16x144xf32> to vector<16x144xbf16>
    %cst_105 = arith.constant dense<0.000000e+00> : vector<16x512xf32>
    %196 = tpu.matmul %195, %193, %cst_105 {dimension_numbers = #tpu.dot_dimension_numbers<[1], [0], [0], [1], [0, 0, 1, 1], [], []>} : vector<16x144xbf16>, vector<144x512xbf16>, vector<16x512xf32> -> vector<16x512xf32>
    %c0_106 = arith.constant 0 : index
    %c0_107 = arith.constant 0 : index
    %197 = vector.load %arg8[%c0_106, %c0_107] : memref<16x1xf32, #tpu.memory_space<vmem>>, vector<16x1xf32>
    %198 = vector.broadcast %197 : vector<16x1xf32> to vector<16x512xf32>
    %199 = arith.addf %196, %198 : vector<16x512xf32>
    %cst_108 = arith.constant 0.000000e+00 : f32
    %200 = vector.broadcast %cst_108 : f32 to vector<16x512xf32>
    %201 = arith.maximumf %199, %200 : vector<16x512xf32>
    %202 = vector.extract_strided_slice %201 {offsets = [0, 0], sizes = [16, 256], strides = [1, 1]} : vector<16x512xf32> to vector<16x256xf32>
    %203 = vector.extract_strided_slice %201 {offsets = [0, 256], sizes = [16, 256], strides = [1, 1]} : vector<16x512xf32> to vector<16x256xf32>
    %204 = arith.subf %202, %203 : vector<16x256xf32>
    %205 = math.absf %204 : vector<16x256xf32>
    %206 = vector.shape_cast %205 : vector<16x256xf32> to vector<1x16x256xf32>
    %cst_109 = arith.constant dense<0.000000e+00> : vector<1xf32>
    %207 = vector.multi_reduction <add>, %206, %cst_109 [1, 2] : vector<1x16x256xf32> to vector<1xf32>
    %208 = vector.shape_cast %207 : vector<1xf32> to vector<1x1x1xf32>
    %209 = vector.extract %208[0, 0, 0] : f32 from vector<1x1x1xf32>
    %210 = arith.truncf %201 : vector<16x512xf32> to vector<16x512xbf16>
    %211 = vector.extract_strided_slice %210 {offsets = [0, 0], sizes = [16, 256], strides = [1, 1]} : vector<16x512xbf16> to vector<16x256xbf16>
    %212 = vector.extract_strided_slice %210 {offsets = [0, 0], sizes = [16, 256], strides = [1, 1]} : vector<16x512xbf16> to vector<16x256xbf16>
    %cst_110 = arith.constant dense<0.000000e+00> : vector<16x16xf32>
    %213 = tpu.matmul %211, %212, %cst_110 {dimension_numbers = #tpu.dot_dimension_numbers<[1], [1], [0], [0], [0, 0, 1, 0], [], []>} : vector<16x256xbf16>, vector<16x256xbf16>, vector<16x16xf32> -> vector<16x16xf32>
    %214 = vector.extract_strided_slice %210 {offsets = [0, 256], sizes = [16, 256], strides = [1, 1]} : vector<16x512xbf16> to vector<16x256xbf16>
    %215 = vector.extract_strided_slice %210 {offsets = [0, 256], sizes = [16, 256], strides = [1, 1]} : vector<16x512xbf16> to vector<16x256xbf16>
    %cst_111 = arith.constant dense<0.000000e+00> : vector<16x16xf32>
    %216 = tpu.matmul %214, %215, %cst_111 {dimension_numbers = #tpu.dot_dimension_numbers<[1], [1], [0], [0], [0, 0, 1, 0], [], []>} : vector<16x256xbf16>, vector<16x256xbf16>, vector<16x16xf32> -> vector<16x16xf32>
    %217 = arith.subf %213, %216 : vector<16x16xf32>
    %218 = math.absf %217 : vector<16x16xf32>
    %219 = vector.shape_cast %218 : vector<16x16xf32> to vector<1x16x16xf32>
    %cst_112 = arith.constant dense<0.000000e+00> : vector<1xf32>
    %220 = vector.multi_reduction <add>, %219, %cst_112 [1, 2] : vector<1x16x16xf32> to vector<1xf32>
    %221 = vector.shape_cast %220 : vector<1xf32> to vector<1x1x1xf32>
    %222 = vector.extract %221[0, 0, 0] : f32 from vector<1x1x1xf32>
    %223 = tpu.iota {dimensions = array<i32: 0>} : vector<8x128xi32>
    %cst_113 = arith.constant 0.000000e+00 : f32
    %224 = vector.broadcast %cst_113 : f32 to vector<8x128xf32>
    %c0_i32 = arith.constant 0 : i32
    %225 = vector.broadcast %c0_i32 : i32 to vector<8x128xi32>
    %226 = arith.cmpi eq, %223, %225 : vector<8x128xi32>
    %227 = vector.broadcast %9 : f32 to vector<8x128xf32>
    %228 = arith.select %226, %227, %224 : vector<8x128xi1>, vector<8x128xf32>
    %c1_i32_114 = arith.constant 1 : i32
    %229 = vector.broadcast %c1_i32_114 : i32 to vector<8x128xi32>
    %230 = arith.cmpi eq, %223, %229 : vector<8x128xi32>
    %231 = vector.broadcast %67 : f32 to vector<8x128xf32>
    %232 = arith.select %230, %231, %228 : vector<8x128xi1>, vector<8x128xf32>
    %c2_i32 = arith.constant 2 : i32
    %233 = vector.broadcast %c2_i32 : i32 to vector<8x128xi32>
    %234 = arith.cmpi eq, %223, %233 : vector<8x128xi32>
    %235 = vector.broadcast %138 : f32 to vector<8x128xf32>
    %236 = arith.select %234, %235, %232 : vector<8x128xi1>, vector<8x128xf32>
    %c3_i32 = arith.constant 3 : i32
    %237 = vector.broadcast %c3_i32 : i32 to vector<8x128xi32>
    %238 = arith.cmpi eq, %223, %237 : vector<8x128xi32>
    %239 = vector.broadcast %209 : f32 to vector<8x128xf32>
    %240 = arith.select %238, %239, %236 : vector<8x128xi1>, vector<8x128xf32>
    %c4_i32 = arith.constant 4 : i32
    %241 = vector.broadcast %c4_i32 : i32 to vector<8x128xi32>
    %242 = arith.cmpi eq, %223, %241 : vector<8x128xi32>
    %243 = vector.broadcast %80 : f32 to vector<8x128xf32>
    %244 = arith.select %242, %243, %240 : vector<8x128xi1>, vector<8x128xf32>
    %c5_i32 = arith.constant 5 : i32
    %245 = vector.broadcast %c5_i32 : i32 to vector<8x128xi32>
    %246 = arith.cmpi eq, %223, %245 : vector<8x128xi32>
    %247 = vector.broadcast %151 : f32 to vector<8x128xf32>
    %248 = arith.select %246, %247, %244 : vector<8x128xi1>, vector<8x128xf32>
    %c6_i32 = arith.constant 6 : i32
    %249 = vector.broadcast %c6_i32 : i32 to vector<8x128xi32>
    %250 = arith.cmpi eq, %223, %249 : vector<8x128xi32>
    %251 = vector.broadcast %222 : f32 to vector<8x128xf32>
    %252 = arith.select %250, %251, %248 : vector<8x128xi1>, vector<8x128xf32>
    %c0_115 = arith.constant 0 : index
    %c0_116 = arith.constant 0 : index
    %c0_117 = arith.constant 0 : index
    %253 = vector.load %arg9[%c0_115, %c0_116, %c0_117] : memref<1x8x128xf32, #tpu.memory_space<vmem>>, vector<1x8x128xf32>
    %254 = vector.shape_cast %253 : vector<1x8x128xf32> to vector<8x128xf32>
    %255 = vector.shape_cast %252 : vector<8x128xf32> to vector<1x8x128xf32>
    tpu.vector_store %arg9[%c0_115, %c0_116, %c0_117], %255 {strides = array<i32>} : memref<1x8x128xf32, #tpu.memory_space<vmem>>, vector<1x8x128xf32>,
    return
  }
  func.func @transform_0(%arg0: i32) -> (i32, i32, i32) {
    %c0_i32 = arith.constant 0 : i32
    %c0_i32_0 = arith.constant 0 : i32
    %c0_i32_1 = arith.constant 0 : i32
    return %arg0, %c0_i32, %c0_i32_0 : i32, i32, i32
  }
  func.func @transform_1(%arg0: i32) -> (i32, i32, i32) {
    %c0_i32 = arith.constant 0 : i32
    %c0_i32_0 = arith.constant 0 : i32
    %c0_i32_1 = arith.constant 0 : i32
    %c0_i32_2 = arith.constant 0 : i32
    return %c0_i32, %c0_i32_0, %c0_i32_1 : i32, i32, i32
  }
  func.func @transform_2(%arg0: i32) -> (i32, i32) {
    %c0_i32 = arith.constant 0 : i32
    %c0_i32_0 = arith.constant 0 : i32
    %c0_i32_1 = arith.constant 0 : i32
    return %c0_i32, %c0_i32_0 : i32, i32
  }
  func.func @transform_3(%arg0: i32) -> (i32, i32) {
    %c0_i32 = arith.constant 0 : i32
    %c0_i32_0 = arith.constant 0 : i32
    %c0_i32_1 = arith.constant 0 : i32
    return %c0_i32, %c0_i32_0 : i32, i32
  }
  func.func @transform_4(%arg0: i32) -> (i32, i32) {
    %c0_i32 = arith.constant 0 : i32
    %c0_i32_0 = arith.constant 0 : i32
    %c0_i32_1 = arith.constant 0 : i32
    return %c0_i32, %c0_i32_0 : i32, i32
  }
  func.func @transform_5(%arg0: i32) -> (i32, i32) {
    %c0_i32 = arith.constant 0 : i32
    %c0_i32_0 = arith.constant 0 : i32
    %c0_i32_1 = arith.constant 0 : i32
    return %c0_i32, %c0_i32_0 : i32, i32
  }
  func.func @transform_6(%arg0: i32) -> (i32, i32) {
    %c0_i32 = arith.constant 0 : i32
    %c0_i32_0 = arith.constant 0 : i32
    %c0_i32_1 = arith.constant 0 : i32
    return %c0_i32, %c0_i32_0 : i32, i32
  }
  func.func @transform_7(%arg0: i32) -> (i32, i32) {
    %c0_i32 = arith.constant 0 : i32
    %c0_i32_0 = arith.constant 0 : i32
    %c0_i32_1 = arith.constant 0 : i32
    return %c0_i32, %c0_i32_0 : i32, i32
  }
  func.func @transform_8(%arg0: i32) -> (i32, i32, i32) {
    %c0_i32 = arith.constant 0 : i32
    %c0_i32_0 = arith.constant 0 : i32
    %c0_i32_1 = arith.constant 0 : i32
    return %arg0, %c0_i32, %c0_i32_0 : i32, i32, i32
  }
}

</mosaic_0001>

<bundles_post_ra>
// kernel: loss_fn.1
= control target key start
LH: loop header
LB: loop body
LE: loop exit
PB: predicated region body
PF: predicated region fallthrough
CT: control target
= control target key end

     0   :  { %s2010_s27 = smov 0   ;;  %s3084_s0 = inlined_call_operand.vmem [shape: f32[2,8,512], index: 0, kind: input, shape index: {}]   ;;  %s3085_s1 = inlined_call_operand.vmem [shape: f32[9,1,512], index: 1, kind: input, shape index: {}]   ;;  %s3086_s2 = inlined_call_operand.vmem [shape: f32[8,72], index: 2, kind: input, shape index: {}]   ;;  %s3087_s3 = inlined_call_operand.vmem [shape: f32[8,1], index: 3, kind: input, shape index: {}]   ;;  %s3088_s4 = inlined_call_operand.vmem [shape: f32[16,72], index: 4, kind: input, shape index: {}]   ;;  %s3089_s5 = inlined_call_operand.vmem [shape: f32[16,1], index: 5, kind: input, shape index: {}]   ;;  %s3090_s6 = inlined_call_operand.vmem [shape: f32[16,144], index: 6, kind: input, shape index: {}]   ;;  %s3091_s7 = inlined_call_operand.vmem [shape: f32[16,1], index: 7, kind: input, shape index: {}]   ;;  %s3092_s8 = inlined_call_operand.vmem [shape: f32[2,8,128], index: 8, kind: output, shape index: {}]  }
   0x1 LB: > { %s1883_s28 = sadd.s32 4294967295, %s1954_s27   ;;  %p1887_p0 = scmp.ge.s32.totalorder %s1954_s27, 1  ;;  %s1954_s27 = sphi %s2010_s27, %s18_s27  }
   0x2   : > { %p262_p1 = scmp.lt.s32.totalorder %s1954_s27, 3 }
   0x4   : > { %p263_p2 = pnand %p1887_p0, %p262_p1 }
   0x6   : > { %266 = sbr.rel (%p263_p2) target bundleno = 1728 (0x6c0), region = 52 }
   0xd   : > { %p295_p3 = scmp.lt.s32.totalorder %s1883_s28, 1  ;;  %s1956_s11 = smov 17   ;;  %v1963_v4 = vmov 0   ;;  %v666_v5 = vld [vmem:[%s3087_s3] sm:$0xff]  ;;  %v331_v6 = vlaneseq  ;;  %v1892_v53 = vld [vmem:[%s3085_s1 + $0x8] sm:$0xf] }
   0xe   : > { %s1957_s12 = smov 16   ;;  %s1958_s13 = smov 15   ;;  %721 = vmatprep.mubr.bf16.mxu0 %v1963_v4  ;;  %762 = vmatprep.mubr.bf16.mxu1 %v1963_v4  ;;  %v338_v12 = vld [vmem:[%s3085_s1] sm:$0xf]  ;;  %v1891_v13 = vld [vmem:[%s3085_s1 + $0x4] sm:$0xf] }
   0xf   : > { %s3168_s28 = smov (!%p295_p3, %s1883_s28), 1  ;;  %s1959_s14 = smov 1   ;;  %1942 = vset.pattern.permute.xlu0 %v1963_v4  ;;  %1943 = vset.pattern.permute.xlu1 %v1963_v4  ;;  %v2109_v7 = vshrl.u32 %v331_v6, 7  ;;  %v2111_v10 = vand.u32 127, %v331_v6  ;;  %v1893_v54 = vld [vmem:[%s3085_s1 + $0xc] sm:$0xf] }
  0x10   : > { %s1910_s29 = sshll.u32 %s3168_s28, 5  ;;  %s1960_s15 = smov 127   ;;  %vm676_vm8 = vcmask 1043456   ;;  %vm672_vm9 = vcmask 588800   ;;  %vm1268_vm10 = vcmask 130048   ;;  %vm875_vm11 = vcmask 64512  }
  0x11   : > { %s2024_s10 = scalar_lea.vmem %s3084_s0, %s1910_s29  ;;  %s1961_s16 = smov 113   ;;  %3126 = vst [vmem:[#allocation2_spill] sm:$0xff] %v2109_v7  ;;  %v2114_v11 = vsub.s32 1, %v2109_v7  ;;  %vm333_vm0 = vcmp.lt.s32.totalorder %v2111_v10, 17  ;;  %v2124_v16 = vsub.s32 0, %v2109_v7  ;;  %v2127_v17 = vsub.s32 3, %v2109_v7 }
  0x12   : > { %v2027_v0 = vld [vmem:[%s2024_s10 + $0x10] sm:$0xff]  ;;  %v2030_v1 = vld [vmem:[%s2024_s10] sm:$0xff]  ;;  %v2037_v2 = vld [vmem:[%s2024_s10 + $0x18] sm:$0xff]  ;;  %s1962_s17 = smov 112   ;;  %s1964_s18 = smov 111   ;;  %v2130_v18 = vsub.s32 2, %v2109_v7 }
  0x13   : > { %327 = vrot.lane.b32.xlu1 %v2027_v0, %s1956_s11  ;;  %323 = vrot.lane.b32.xlu0 %v2030_v1, %s1956_s11  ;;  %v2040_v3 = vld [vmem:[%s2024_s10 + $0x8] sm:$0xff]  ;;  %vm372_vm1 = vcmp.lt.s32.totalorder %v2111_v10, 16  ;;  %v2134_v19 = vrot.slane %v338_v12, %v2114_v11  ;;  %v2137_v20 = vrot.slane %v1891_v13, %v2114_v11  ;;  %v2142_v24 = vrot.slane %v338_v12, %v2124_v16  ;;  %s1890_s23 = sshll.u32 %s3168_s28, 3 }
  0x14   : > { %v2145_v25 = vrot.slane %v1891_v13, %v2124_v16  ;;  %v2148_v26 = vrot.slane %v338_v12, %v2127_v17  ;;  %v2155_v29 = vrot.slane %v1891_v13, %v2127_v17  ;;  %v2158_v30 = vrot.slane %v338_v12, %v2130_v18 }
  0x15   : > { %v2165_v34 = vrot.slane %v1891_v13, %v2130_v18  ;;  %vm412_vm2 = vcmp.lt.s32.totalorder %v2111_v10, 15  ;;  %v2189_v57 = vrot.slane %v1892_v53, %v2114_v11  ;;  %vm452_vm3 = vcmp.lt.s32.totalorder %v2111_v10, 1 }
  0x16   : > { %v2193_v58 = vrot.slane %v1893_v54, %v2114_v11  ;;  %v2198_v60 = vrot.slane %v1892_v53, %v2124_v16  ;;  %v2201_v61 = vrot.slane %v1892_v53, %v2130_v18  ;;  %v2204_v62 = vrot.slane %v1892_v53, %v2127_v17 }
  0x17   : > { %329 = vrot.lane.b32.xlu1 %v2037_v2, %s1956_s11  ;;  %325 = vrot.lane.b32.xlu0 %v2040_v3, %s1956_s11  ;;  %v2214_v12 = vrot.slane %v1893_v54, %v2130_v18  ;;  %vm492_vm4 = vcmp.lt.s32.totalorder %v2111_v10, 127  ;;  %vm572_vm5 = vcmp.lt.s32.totalorder %v2111_v10, 112  ;;  %vm532_vm6 = vcmp.lt.s32.totalorder %v2111_v10, 113 }
  0x18   : > { %vm612_vm7 = vcmp.lt.s32.totalorder %v2111_v10, 111 }
  0x1b   : > { %366 = vrot.lane.b32.xlu1 %v2040_v3, %s1957_s12  ;;  %364 = vrot.lane.b32.xlu0 %v2030_v1, %s1957_s12 }
  0x1f   : > { %370 = vrot.lane.b32.xlu1 %v2037_v2, %s1957_s12  ;;  %368 = vrot.lane.b32.xlu0 %v2027_v0, %s1957_s12 }
  0x23   : > { %406 = vrot.lane.b32.xlu1 %v2040_v3, %s1958_s13  ;;  %404 = vrot.lane.b32.xlu0 %v2030_v1, %s1958_s13 }
  0x27   : > { %410 = vrot.lane.b32.xlu1 %v2037_v2, %s1958_s13  ;;  %408 = vrot.lane.b32.xlu0 %v2027_v0, %s1958_s13 }
  0x2b   : > { %446 = vrot.lane.b32.xlu1 %v2040_v3, %s1959_s14  ;;  %444 = vrot.lane.b32.xlu0 %v2030_v1, %s1959_s14 }
  0x2f   : > { %450 = vrot.lane.b32.xlu1 %v2037_v2, %s1959_s14  ;;  %448 = vrot.lane.b32.xlu0 %v2027_v0, %s1959_s14 }
  0x33   : > { %486 = vrot.lane.b32.xlu1 %v2040_v3, %s1960_s15  ;;  %484 = vrot.lane.b32.xlu0 %v2030_v1, %s1960_s15 }
  0x37   : > { %490 = vrot.lane.b32.xlu1 %v2037_v2, %s1960_s15  ;;  %488 = vrot.lane.b32.xlu0 %v2027_v0, %s1960_s15 }
  0x3b   : > { %526 = vrot.lane.b32.xlu1 %v2040_v3, %s1961_s16  ;;  %524 = vrot.lane.b32.xlu0 %v2030_v1, %s1961_s16 }
  0x3f   : > { %530 = vrot.lane.b32.xlu1 %v2037_v2, %s1961_s16  ;;  %528 = vrot.lane.b32.xlu0 %v2027_v0, %s1961_s16 }
  0x43   : > { %566 = vrot.lane.b32.xlu1 %v2040_v3, %s1962_s17  ;;  %564 = vrot.lane.b32.xlu0 %v2030_v1, %s1962_s17 }
  0x47   : > { %570 = vrot.lane.b32.xlu1 %v2037_v2, %s1962_s17  ;;  %568 = vrot.lane.b32.xlu0 %v2027_v0, %s1962_s17 }
  0x4b   : > { %606 = vrot.lane.b32.xlu1 %v2040_v3, %s1964_s18  ;;  %604 = vrot.lane.b32.xlu0 %v2030_v1, %s1964_s18 }
  0x4f   : > { %610 = vrot.lane.b32.xlu1 %v2037_v2, %s1964_s18  ;;  %608 = vrot.lane.b32.xlu0 %v2027_v0, %s1964_s18 }
  0x53   : > { %669 = vperm.xlu0 %1942, %v666_v5  }
  0x85   : > { %v328_v8 = vpop.permute.xlu1 %327  ;;  %v324_v9 = vpop.permute.xlu0 %323 }
  0x89   : > { %v330_v14 = vpop.permute.xlu1 %329  ;;  %v326_v15 = vpop.permute.xlu0 %325 }
  0x8a   : > { %v336_v21 = vsel %vm333_vm0, %v324_v9, %v326_v15  ;;  %v337_v27 = vsel %vm333_vm0, %v330_v14, %v324_v9  ;;  %v334_v33 = vsel %vm333_vm0, %v328_v8, %v330_v14  ;;  %v335_v35 = vsel %vm333_vm0, %v326_v15, %v328_v8 }
  0x8b   : > { %v361_v31 = vmul.f32 %v2134_v19, %v336_v21  ;;  %v360_v39 = vmul.f32 %v2142_v24, %v337_v27  ;;  %v363_v42 = vmul.f32 %v2148_v26, %v334_v33  ;;  %v362_v46 = vmul.f32 %v2158_v30, %v335_v35 }
  0x8c   : > { %v2211_v9 = vrot.slane %v1893_v54, %v2124_v16  ;;  %v2221_v21 = vrot.slane %v1893_v54, %v2127_v17 }
  0x8d   : > { %v367_v22 = vpop.permute.xlu1 %366  ;;  %v365_v23 = vpop.permute.xlu0 %364 }
  0x8e   : > { %v375_v28 = vsel %vm372_vm1, %v365_v23, %v367_v22 }
  0x8f   : > { %v401_v32 = vmul.f32 %v2137_v20, %v375_v28 }
  0x91   : > { %v371_v36 = vpop.permute.xlu1 %370  ;;  %v369_v37 = vpop.permute.xlu0 %368  ;;  %v645_v38 = vpack.c.bf16 %v401_v32, %v361_v31 }
  0x92   : > { %v376_v40 = vsel %vm372_vm1, %v371_v36, %v365_v23  ;;  %v374_v41 = vsel %vm372_vm1, %v367_v22, %v369_v37  ;;  %v373_v43 = vsel %vm372_vm1, %v369_v37, %v371_v36 }
  0x93   : > { %689 = vmatprep.subr.bf16.mxu0 %v645_v38  ;;  %v400_v44 = vmul.f32 %v2145_v25, %v376_v40  ;;  %v403_v45 = vmul.f32 %v2155_v29, %v373_v43  ;;  %v402_v47 = vmul.f32 %v2165_v34, %v374_v41  ;;  %v1894_v41 = vld [vmem:[%s3085_s1 + $0x14] sm:$0xf] }
  0x95   : > { %v407_v48 = vpop.permute.xlu1 %406  ;;  %v405_v49 = vpop.permute.xlu0 %404  ;;  %v644_v50 = vpack.c.bf16 %v400_v44, %v360_v39  ;;  %v647_v51 = vpack.c.bf16 %v403_v45, %v363_v42  ;;  %v646_v52 = vpack.c.bf16 %v402_v47, %v362_v46  ;;  %v2242_v47 = vrot.slane %v1894_v41, %v2124_v16 }
  0x96   : > { %v415_v59 = vsel %vm412_vm2, %v405_v49, %v407_v48 }
  0x97   : > { %690 = vmatpush1.bf16.msra.mxu0 %v644_v50  ;;  %730 = vmatprep.subr.bf16.mxu1 %v647_v51  ;;  %v441_v13 = vmul.f32 %v2189_v57, %v415_v59  ;;  %v2250_v50 = vrot.slane %v1894_v41, %v2114_v11  ;;  %v2253_v51 = vrot.slane %v1894_v41, %v2130_v18 }
  0x98   : > { %731 = vmatpush1.bf16.msra.mxu1 %v646_v52 }
  0x99   : > { %v411_v55 = vpop.permute.xlu1 %410  ;;  %v409_v56 = vpop.permute.xlu0 %408 }
  0x9a   : > { %v416_v6 = vsel %vm412_vm2, %v411_v55, %v405_v49  ;;  %v414_v14 = vsel %vm412_vm2, %v407_v48, %v409_v56  ;;  %v413_v22 = vsel %vm412_vm2, %v409_v56, %v411_v55  ;;  %v2245_v48 = vrot.slane %v1894_v41, %v2127_v17 }
  0x9b   : > { %v440_v23 = vmul.f32 %v2198_v60, %v416_v6  ;;  %v442_v32 = vmul.f32 %v2201_v61, %v414_v14  ;;  %v443_v37 = vmul.f32 %v2204_v62, %v413_v22 }
  0x9d   : > { %v447_v63 = vpop.permute.xlu1 %446  ;;  %v445_v5 = vpop.permute.xlu0 %444 }
  0x9e   : > { %v455_v8 = vsel %vm452_vm3, %v445_v5, %v447_v63 }
  0x9f   : > { %v481_v15 = vmul.f32 %v2193_v58, %v455_v8 }
  0xa1   : > { %v451_v27 = vpop.permute.xlu1 %450  ;;  %v449_v28 = vpop.permute.xlu0 %448  ;;  %v649_v31 = vpack.c.bf16 %v481_v15, %v441_v13 }
  0xa2   : > { %v456_v33 = vsel %vm452_vm3, %v451_v27, %v445_v5  ;;  %v453_v35 = vsel %vm452_vm3, %v449_v28, %v451_v27  ;;  %v454_v36 = vsel %vm452_vm3, %v447_v63, %v449_v28 }
  0xa3   : > { %v480_v38 = vmul.f32 %v2211_v9, %v456_v33  ;;  %v482_v39 = vmul.f32 %v2214_v12, %v454_v36  ;;  %v483_v40 = vmul.f32 %v2221_v21, %v453_v35  ;;  %691 = vmatprep.subr.bf16.mxu0 %v649_v31  ;;  %v1896_v31 = vld [vmem:[%s3085_s1 + $0x1c] sm:$0xf] }
  0xa4   : > { %v2302_v41 = vrot.slane %v1896_v31, %v2114_v11 }
  0xa5   : > { %v487_v42 = vpop.permute.xlu1 %486  ;;  %v485_v43 = vpop.permute.xlu0 %484  ;;  %v648_v44 = vpack.c.bf16 %v480_v38, %v440_v23  ;;  %v651_v45 = vpack.c.bf16 %v483_v40, %v443_v37  ;;  %v650_v46 = vpack.c.bf16 %v482_v39, %v442_v32  ;;  %v2291_v37 = vrot.slane %v1896_v31, %v2124_v16  ;;  %v1897_v38 = vld [vmem:[%s3085_s1 + $0x20] sm:$0xf] }
  0xa6   : > { %v495_v49 = vsel %vm492_vm4, %v485_v43, %v487_v42  ;;  %v2299_v40 = vrot.slane %v1896_v31, %v2127_v17  ;;  %3132 = vst [vmem:[#allocation8_spill] sm:$0xff] %v2302_v41 }
  0xa7   : > { %692 = vmatpush1.bf16.msra.mxu0 %v648_v44  ;;  %732 = vmatprep.subr.bf16.mxu1 %v651_v45  ;;  %v520_v54 = vmul.f32 %v2242_v47, %v495_v49  ;;  %3130 = vst [vmem:[#allocation6_spill] sm:$0xff] %v2291_v37 }
  0xa8   : > { %733 = vmatpush1.bf16.msra.mxu1 %v650_v46  ;;  %3131 = vst [vmem:[#allocation7_spill] sm:$0xff] %v2299_v40 }
  0xa9   : > { %v491_v52 = vpop.permute.xlu1 %490  ;;  %v489_v53 = vpop.permute.xlu0 %488  ;;  %v652_v23 = vpack.c.bf16 %v520_v54, %v2030_v1  ;;  %v2318_v54 = vrot.slane %v1897_v38, %v2124_v16 }
  0xaa   : > { %v496_v55 = vsel %vm492_vm4, %v491_v52, %v485_v43  ;;  %v493_v56 = vsel %vm492_vm4, %v489_v53, %v491_v52  ;;  %v494_v59 = vsel %vm492_vm4, %v487_v42, %v489_v53  ;;  %v2305_v42 = vrot.slane %v1896_v31, %v2130_v18 }
  0xab   : > { %v523_v63 = vmul.f32 %v2245_v48, %v496_v55  ;;  %v521_v5 = vmul.f32 %v2250_v50, %v494_v59  ;;  %v522_v6 = vmul.f32 %v2253_v51, %v493_v56  ;;  %3135 = vst [vmem:[#allocation11_spill] sm:$0xff] %v2318_v54 }
  0xac   : > { %3133 = vst [vmem:[#allocation9_spill] sm:$0xff] %v2305_v42 }
  0xad   : > { %v527_v8 = vpop.permute.xlu1 %526  ;;  %v525_v13 = vpop.permute.xlu0 %524  ;;  %v653_v14 = vpack.c.bf16 %v521_v5, %v2040_v3  ;;  %v655_v15 = vpack.c.bf16 %v523_v63, %v2037_v2  ;;  %v654_v22 = vpack.c.bf16 %v522_v6, %v2027_v0  ;;  %v1895_v3 = vld [vmem:[%s3085_s1 + $0x18] sm:$0xf] }
  0xae   : > { %v2278_v0 = vrot.slane %v1895_v3, %v2127_v17  ;;  %v2281_v1 = vrot.slane %v1895_v3, %v2114_v11  ;;  %v2286_v35 = vrot.slane %v1895_v3, %v2130_v18  ;;  %v2308_v43 = vrot.slane %v1895_v3, %v2124_v16 }
  0xaf   : > { %693 = vmatprep.subr.bf16.mxu0 %v653_v14  ;;  %734 = vmatprep.subr.bf16.mxu1 %v655_v15  ;;  %v535_v45 = vsel %vm532_vm6, %v525_v13, %v527_v8  ;;  %v2335_v3 = vrot.slane %v1897_v38, %v2127_v17 }
  0xb0   : > { %694 = vmatpush1.bf16.msra.mxu0 %v652_v23  ;;  %735 = vmatpush1.bf16.msra.mxu1 %v654_v22  ;;  %3127 = vst [vmem:[#allocation3_spill] sm:$0xff] %v2278_v0  ;;  %3128 = vst [vmem:[#allocation4_spill] sm:$0xff] %v2281_v1 }
  0xb1   : > { %v531_v27 = vpop.permute.xlu1 %530  ;;  %v529_v28 = vpop.permute.xlu0 %528  ;;  %3129 = vst [vmem:[#allocation5_spill] sm:$0xff] %v2286_v35  ;;  %3134 = vst [vmem:[#allocation10_spill] sm:$0xff] %v2308_v43 }
  0xb2   : > { %v536_v33 = vsel %vm532_vm6, %v531_v27, %v525_v13  ;;  %v534_v36 = vsel %vm532_vm6, %v527_v8, %v529_v28  ;;  %v533_v44 = vsel %vm532_vm6, %v529_v28, %v531_v27  ;;  %v560_v13 = vmul.f32 %v2308_v43, %v535_v45  ;;  %3136 = vst [vmem:[#allocation12_spill] sm:$0xff] %v2335_v3 }
  0xb3   : > { %v563_v46 = vmul.f32 %v2278_v0, %v536_v33  ;;  %v561_v49 = vmul.f32 %v2281_v1, %v534_v36  ;;  %v562_v5 = vmul.f32 %v2286_v35, %v533_v44  ;;  %v2342_v33 = vrot.slane %v1897_v38, %v2130_v18 }
  0xb5   : > { %v567_v2 = vpop.permute.xlu1 %566  ;;  %v565_v32 = vpop.permute.xlu0 %564  ;;  %3138 = vst [vmem:[#allocation14_spill] sm:$0xff] %v2342_v33 }
  0xb6   : > { %v575_v39 = vsel %vm572_vm5, %v565_v32, %v567_v2 }
  0xb7   : > { %v600_v55 = vmul.f32 %v2291_v37, %v575_v39 }
  0xb9   : > { %v571_v52 = vpop.permute.xlu1 %570  ;;  %v569_v53 = vpop.permute.xlu0 %568  ;;  %v656_v31 = vpack.c.bf16 %v600_v55, %v560_v13 }
  0xba   : > { %v576_v56 = vsel %vm572_vm5, %v571_v52, %v565_v32  ;;  %v573_v59 = vsel %vm572_vm5, %v569_v53, %v571_v52  ;;  %v574_v63 = vsel %vm572_vm5, %v567_v2, %v569_v53  ;;  %v2338_v2 = vrot.slane %v1897_v38, %v2114_v11  ;;  %v664_v38 = vld [vmem:[%s3086_s2] sm:$0xff] }
  0xbb   : > { %v603_v6 = vmul.f32 %v2299_v40, %v576_v56  ;;  %v601_v8 = vmul.f32 %v2302_v41, %v574_v63  ;;  %v602_v16 = vmul.f32 %v2305_v42, %v573_v59  ;;  %v665_v63 = vpack.c.bf16 %v664_v38, %v664_v38 }
  0xbc   : > { %3137 = vst [vmem:[#allocation13_spill] sm:$0xff] %v2338_v2 }
  0xbd   : > { %v607_v14 = vpop.permute.xlu1 %606  ;;  %v605_v15 = vpop.permute.xlu0 %604  ;;  %v657_v22 = vpack.c.bf16 %v601_v8, %v561_v49  ;;  %v659_v23 = vpack.c.bf16 %v603_v6, %v563_v46  ;;  %v658_v27 = vpack.c.bf16 %v602_v16, %v562_v5 }
  0xbe   : > { %v615_v28 = vsel %vm612_vm7, %v605_v15, %v607_v14 }
  0xbf   : > { %695 = vmatprep.subr.bf16.mxu0 %v657_v22  ;;  %736 = vmatprep.subr.bf16.mxu1 %v659_v23  ;;  %v640_v32 = vmul.f32 %v2318_v54, %v615_v28 }
  0xc0   : > { %696 = vmatpush1.bf16.msra.mxu0 %v656_v31  ;;  %737 = vmatpush1.bf16.msra.mxu1 %v658_v27 }
  0xc1   : > { %v611_v36 = vpop.permute.xlu1 %610  ;;  %v609_v39 = vpop.permute.xlu0 %608  ;;  %v660_v49 = vpack.c.bf16 %v640_v32, %v640_v32 }
  0xc2   : > { %v616_v44 = vsel %vm612_vm7, %v611_v36, %v605_v15  ;;  %v613_v17 = vsel %vm612_vm7, %v609_v39, %v611_v36  ;;  %v614_v45 = vsel %vm612_vm7, %v607_v14, %v609_v39 }
  0xc3   : > { %v643_v11 = vmul.f32 %v2335_v3, %v616_v44  ;;  %v641_v46 = vmul.f32 %v2338_v2, %v614_v45  ;;  %v642_v18 = vmul.f32 %v2342_v33, %v613_v17  ;;  %v678_v56 = vsel %vm676_vm8, %v660_v49, 0 }
  0xc5   : > { %v663_v52 = vpack.c.bf16 %v643_v11, %v643_v11  ;;  %v661_v53 = vpack.c.bf16 %v641_v46, %v641_v46  ;;  %v662_v55 = vpack.c.bf16 %v642_v18, %v642_v18  ;;  %v1038_v18 = vld [vmem:[%s3089_s5 + $0x8] sm:$0xff] }
  0xc7   : > { %1898 = vmatprep.subr.msk.bf16.mxu0 %vm676_vm8, %v661_v53  ;;  %1900 = vmatprep.subr.msk.bf16.mxu1 %vm676_vm8, %v663_v52  ;;  %v684_v59 = vsel %vm676_vm8, %v662_v55, 0 }
  0xc8   : > { %698 = vmatpush1.bf16.msra.mxu0 %v678_v56  ;;  %739 = vmatpush1.bf16.msra.mxu1 %v684_v59 }
  0xcb   : > { %1899 = vmatmul.mubr.msk.bf16.vlgmr.msra.gmra.mrb[0].mxu0 %vm672_vm9, %v665_v63  ;;  %1901 = vmatmul.mubr.msk.bf16.vlgmr.msra.gmra.mrb[0].mxu1 %vm672_vm9, %v665_v63 }
  0xd2   : > { %v670_v5 = vpop.permute.xlu0 %669 }
 0x19e   : > { %v723_v6 = vpop.f32.mrb[0].mxu0  ;;  %v764_v8 = vpop.f32.mrb[0].mxu1 }
 0x19f   : > { %v724_v16 = vadd.f32 %v723_v6, %v670_v5  ;;  %v765_v13 = vadd.f32 %v764_v8, %v670_v5  ;;  %v725_v14 = vpop.f32.mrb[1].mxu0  ;;  %v766_v15 = vpop.f32.mrb[1].mxu1 }
 0x1a0   : > { %v726_v22 = vadd.f32 %v725_v14, %v670_v5  ;;  %v767_v23 = vadd.f32 %v766_v15, %v670_v5  ;;  %v727_v27 = vpop.f32.mrb[2].mxu0  ;;  %v768_v28 = vpop.f32.mrb[2].mxu1 }
 0x1a1   : > { %v2362_v31 = vmax.f32 %v724_v16, 0.0  ;;  %v2364_v32 = vmax.f32 %v765_v13, 0.0  ;;  %v728_v36 = vpop.f32.mrb[3].mxu0  ;;  %v769_v39 = vpop.f32.mrb[3].mxu1 }
 0x1a2   : > { %v2366_v44 = vmax.f32 %v726_v22, 0.0  ;;  %v2368_v17 = vmax.f32 %v767_v23, 0.0 }
 0x1a3   : > { %890 = vrot.lane.b32.xlu0 %v2364_v32, %s1956_s11  ;;  %886 = vrot.lane.b32.xlu1 %v2362_v31, %s1956_s11  ;;  %v791_v46 = vpack.c.bf16 %v2364_v32, %v2364_v32  ;;  %v789_v49 = vpack.c.bf16 %v2362_v31, %v2362_v31 }
 0x1a4   : > { %v790_v45 = vpack.c.bf16 %v2366_v44, %v2366_v44  ;;  %v792_v11 = vpack.c.bf16 %v2368_v17, %v2368_v17 }
 0x1a6   : > { %793 = vmatprep.subr.bf16.mxu0 %v790_v45  ;;  %825 = vmatprep.mubr.bf16.mxu0 %v790_v45 }
 0x1a7   : > { %833 = vmatprep.subr.bf16.mxu1 %v792_v11  ;;  %865 = vmatprep.mubr.bf16.mxu1 %v792_v11 }
 0x1a8   : > { %834 = vmatpush1.bf16.xpose.msra.mxu1 %v791_v46  ;;  %902 = vrot.lane.b32.xlu0 %v2362_v31, %s1957_s12 }
 0x1a9   : > { %888 = vrot.lane.b32.xlu1 %v2366_v44, %s1956_s11  ;;  %794 = vmatpush1.bf16.xpose.msra.mxu0 %v789_v49 }
 0x1ac   : > { %906 = vrot.lane.b32.xlu0 %v2364_v32, %s1957_s12 }
 0x1ad   : > { %892 = vrot.lane.b32.xlu1 %v2368_v17, %s1956_s11 }
 0x1af   : > { %866 = vmatmul.mubr.bf16.vlgmr.msra.gmra.mrb[4].mxu1 %v791_v46 }
 0x1b0   : > { %826 = vmatmul.mubr.bf16.vlgmr.msra.gmra.mrb[4].mxu0 %v789_v49  ;;  %918 = vrot.lane.b32.xlu0 %v2362_v31, %s1958_s13 }
 0x1b1   : > { %904 = vrot.lane.b32.xlu1 %v2366_v44, %s1957_s12  ;;  %1096 = vmatprep.mubr.bf16.mxu0 %v1963_v4 }
 0x1b2   : > { %1139 = vmatprep.mubr.bf16.mxu1 %v1963_v4  ;;  %v1037_v4 = vld [vmem:[%s3089_s5] sm:$0xff] }
 0x1b4   : > { %922 = vrot.lane.b32.xlu0 %v2364_v32, %s1958_s13 }
 0x1b5   : > { %908 = vrot.lane.b32.xlu1 %v2368_v17, %s1957_s12 }
 0x1b8   : > { %934 = vrot.lane.b32.xlu0 %v2362_v31, %s1959_s14 }
 0x1b9   : > { %920 = vrot.lane.b32.xlu1 %v2366_v44, %s1958_s13 }
 0x1bc   : > { %938 = vrot.lane.b32.xlu0 %v2364_v32, %s1959_s14 }
 0x1bd   : > { %924 = vrot.lane.b32.xlu1 %v2368_v17, %s1958_s13 }
 0x1c0   : > { %950 = vrot.lane.b32.xlu0 %v2362_v31, %s1960_s15 }
 0x1c1   : > { %936 = vrot.lane.b32.xlu1 %v2366_v44, %s1959_s14 }
 0x1c4   : > { %954 = vrot.lane.b32.xlu0 %v2364_v32, %s1960_s15 }
 0x1c5   : > { %940 = vrot.lane.b32.xlu1 %v2368_v17, %s1959_s14 }
 0x1c8   : > { %966 = vrot.lane.b32.xlu0 %v2362_v31, %s1961_s16 }
 0x1c9   : > { %952 = vrot.lane.b32.xlu1 %v2366_v44, %s1960_s15 }
 0x1cc   : > { %970 = vrot.lane.b32.xlu0 %v2364_v32, %s1961_s16 }
 0x1cd   : > { %956 = vrot.lane.b32.xlu1 %v2368_v17, %s1960_s15 }
 0x1d0   : > { %982 = vrot.lane.b32.xlu0 %v2362_v31, %s1962_s17 }
 0x1d1   : > { %968 = vrot.lane.b32.xlu1 %v2366_v44, %s1961_s16 }
 0x1d4   : > { %986 = vrot.lane.b32.xlu0 %v2364_v32, %s1962_s17 }
 0x1d5   : > { %972 = vrot.lane.b32.xlu1 %v2368_v17, %s1961_s16 }
 0x1d8   : > { %998 = vrot.lane.b32.xlu0 %v2362_v31, %s1964_s18 }
 0x1d9   : > { %984 = vrot.lane.b32.xlu1 %v2366_v44, %s1962_s17 }
 0x1dc   : > { %1002 = vrot.lane.b32.xlu0 %v2364_v32, %s1964_s18 }
 0x1dd   : > { %988 = vrot.lane.b32.xlu1 %v2368_v17, %s1962_s17 }
 0x1e0   : > { %1041 = vperm.xlu0 %1942, %v1037_v4  }
 0x1e1   : > { %1000 = vrot.lane.b32.xlu1 %v2366_v44, %s1964_s18 }
 0x1e5   : > { %1004 = vrot.lane.b32.xlu1 %v2368_v17, %s1964_s18 }
 0x1e9   : > { %1046 = vperm.xlu1 %1943, %v1038_v18  }
 0x215   : > { %v891_v38 = vpop.permute.xlu0 %890  ;;  %v887_v52 = vpop.permute.xlu1 %886 }
 0x21a   : > { %v903_v53 = vpop.permute.xlu0 %902 }
 0x21b   : > { %v889_v55 = vpop.permute.xlu1 %888 }
 0x21c   : > { %v896_v63 = vsel %vm333_vm0, %v887_v52, %v889_v55  ;;  %v895_v27 = vsel %vm333_vm0, %v889_v55, %v891_v38 }
 0x21d   : > { %v899_v16 = vmul.f32 %v896_v63, %v2134_v19 }
 0x21e   : > { %v907_v56 = vpop.permute.xlu0 %906 }
 0x21f   : > { %v893_v59 = vpop.permute.xlu1 %892 }
 0x220   : > { %v894_v15 = vsel %vm333_vm0, %v891_v38, %v893_v59  ;;  %v897_v22 = vsel %vm333_vm0, %v893_v59, %v887_v52  ;;  %v900_v38 = vmul.f32 %v895_v27, %v2158_v30 }
 0x221   : > { %v898_v46 = vmul.f32 %v897_v22, %v2142_v24  ;;  %v901_v49 = vmul.f32 %v894_v15, %v2148_v26 }
 0x222   : > { %v919_v5 = vpop.permute.xlu0 %918 }
 0x223   : > { %v905_v6 = vpop.permute.xlu1 %904 }
 0x224   : > { %v912_v8 = vsel %vm372_vm1, %v903_v53, %v905_v6  ;;  %v911_v13 = vsel %vm372_vm1, %v905_v6, %v907_v56 }
 0x225   : > { %v915_v14 = vmul.f32 %v912_v8, %v2137_v20  ;;  %v916_v39 = vmul.f32 %v911_v13, %v2165_v34 }
 0x226   : > { %v923_v23 = vpop.permute.xlu0 %922 }
 0x227   : > { %v909_v28 = vpop.permute.xlu1 %908  ;;  %v1015_v36 = vpack.c.bf16 %v915_v14, %v899_v16  ;;  %v1016_v6 = vpack.c.bf16 %v916_v39, %v900_v38 }
 0x228   : > { %v910_v45 = vsel %vm372_vm1, %v907_v56, %v909_v28  ;;  %v913_v11 = vsel %vm372_vm1, %v909_v28, %v903_v53 }
 0x229   : > { %v914_v4 = vmul.f32 %v913_v11, %v2145_v25  ;;  %v917_v18 = vmul.f32 %v910_v45, %v2155_v29  ;;  %1064 = vmatprep.subr.bf16.mxu0 %v1015_v36 }
 0x22a   : > { %v935_v52 = vpop.permute.xlu0 %934 }
 0x22b   : > { %v1014_v55 = vpack.c.bf16 %v914_v4, %v898_v46  ;;  %v921_v59 = vpop.permute.xlu1 %920  ;;  %v1017_v63 = vpack.c.bf16 %v917_v18, %v901_v49 }
 0x22c   : > { %v928_v8 = vsel %vm412_vm2, %v919_v5, %v921_v59  ;;  %v927_v45 = vsel %vm412_vm2, %v921_v59, %v923_v23 }
 0x22d   : > { %1065 = vmatpush1.bf16.msra.mxu0 %v1014_v55  ;;  %1107 = vmatprep.subr.bf16.mxu1 %v1017_v63  ;;  %v931_v15 = vmul.f32 %v928_v8, %v2189_v57 }
 0x22e   : > { %1108 = vmatpush1.bf16.msra.mxu1 %v1016_v6  ;;  %v939_v53 = vpop.permute.xlu0 %938 }
 0x22f   : > { %v925_v56 = vpop.permute.xlu1 %924 }
 0x230   : > { %v926_v28 = vsel %vm412_vm2, %v923_v23, %v925_v56  ;;  %v929_v36 = vsel %vm412_vm2, %v925_v56, %v919_v5  ;;  %v932_v23 = vmul.f32 %v927_v45, %v2201_v61 }
 0x231   : > { %v930_v38 = vmul.f32 %v929_v36, %v2198_v60  ;;  %v933_v55 = vmul.f32 %v926_v28, %v2204_v62 }
 0x232   : > { %v951_v16 = vpop.permute.xlu0 %950 }
 0x233   : > { %v937_v13 = vpop.permute.xlu1 %936 }
 0x234   : > { %v944_v14 = vsel %vm452_vm3, %v935_v52, %v937_v13  ;;  %v943_v22 = vsel %vm452_vm3, %v937_v13, %v939_v53 }
 0x235   : > { %v947_v27 = vmul.f32 %v944_v14, %v2193_v58  ;;  %v948_v49 = vmul.f32 %v943_v22, %v2214_v12 }
 0x236   : > { %v955_v39 = vpop.permute.xlu0 %954 }
 0x237   : > { %v941_v11 = vpop.permute.xlu1 %940  ;;  %v1019_v46 = vpack.c.bf16 %v947_v27, %v931_v15  ;;  %v1020_v13 = vpack.c.bf16 %v948_v49, %v932_v23 }
 0x238   : > { %v942_v4 = vsel %vm452_vm3, %v939_v53, %v941_v11  ;;  %v945_v18 = vsel %vm452_vm3, %v941_v11, %v935_v52 }
 0x239   : > { %v946_v5 = vmul.f32 %v945_v18, %v2211_v9  ;;  %v949_v63 = vmul.f32 %v942_v4, %v2221_v21  ;;  %1066 = vmatprep.subr.bf16.mxu0 %v1019_v46 }
 0x23a   : > { %v967_v59 = vpop.permute.xlu0 %966 }
 0x23b   : > { %v1018_v6 = vpack.c.bf16 %v946_v5, %v930_v38  ;;  %v953_v56 = vpop.permute.xlu1 %952  ;;  %v1021_v8 = vpack.c.bf16 %v949_v63, %v933_v55 }
 0x23c   : > { %v959_v53 = vsel %vm492_vm4, %v953_v56, %v955_v39  ;;  %v960_v52 = vsel %vm492_vm4, %v951_v16, %v953_v56 }
 0x23d   : > { %v962_v14 = vmul.f32 %v960_v52, %v2242_v47  ;;  %v963_v15 = vmul.f32 %v959_v53, %v2250_v50  ;;  %1067 = vmatpush1.bf16.msra.mxu0 %v1018_v6  ;;  %1109 = vmatprep.subr.bf16.mxu1 %v1021_v8 }
 0x23e   : > { %1110 = vmatpush1.bf16.msra.mxu1 %v1020_v13  ;;  %v971_v22 = vpop.permute.xlu0 %970 }
 0x23f   : > { %v1022_v27 = vpack.c.bf16 %v962_v14, %v2362_v31  ;;  %v957_v28 = vpop.permute.xlu1 %956  ;;  %v1023_v36 = vpack.c.bf16 %v963_v15, %v2366_v44 }
 0x240   : > { %v958_v45 = vsel %vm492_vm4, %v955_v39, %v957_v28  ;;  %v961_v11 = vsel %vm492_vm4, %v957_v28, %v951_v16 }
 0x241   : > { %v964_v46 = vmul.f32 %v958_v45, %v2253_v51  ;;  %v965_v49 = vmul.f32 %v961_v11, %v2245_v48  ;;  %1068 = vmatprep.subr.bf16.mxu0 %v1023_v36 }
 0x242   : > { %1069 = vmatpush1.bf16.msra.mxu0 %v1022_v27  ;;  %v983_v4 = vpop.permute.xlu0 %982 }
 0x243   : > { %v1024_v18 = vpack.c.bf16 %v964_v46, %v2364_v32  ;;  %v969_v38 = vpop.permute.xlu1 %968  ;;  %v1025_v55 = vpack.c.bf16 %v965_v49, %v2368_v17 }
 0x244   : > { %v975_v39 = vsel %vm532_vm6, %v969_v38, %v971_v22  ;;  %v976_v16 = vsel %vm532_vm6, %v967_v59, %v969_v38 }
 0x245   : > { %1111 = vmatprep.subr.bf16.mxu1 %v1025_v55  ;;  %v978_v8 = vmul.f32 %v976_v16, %v2308_v43  ;;  %v979_v13 = vmul.f32 %v975_v39, %v2281_v1 }
 0x246   : > { %1112 = vmatpush1.bf16.msra.mxu1 %v1024_v18  ;;  %v987_v5 = vpop.permute.xlu0 %986 }
 0x247   : > { %v973_v63 = vpop.permute.xlu1 %972 }
 0x248   : > { %v974_v15 = vsel %vm532_vm6, %v971_v22, %v973_v63  ;;  %v977_v27 = vsel %vm532_vm6, %v973_v63, %v967_v59 }
 0x249   : > { %v980_v49 = vmul.f32 %v974_v15, %v2286_v35  ;;  %v981_v18 = vmul.f32 %v977_v27, %v2278_v0 }
 0x24a   : > { %v999_v53 = vpop.permute.xlu0 %998 }
 0x24b   : > { %v985_v23 = vpop.permute.xlu1 %984 }
 0x24c   : > { %v991_v6 = vsel %vm572_vm5, %v985_v23, %v987_v5  ;;  %v992_v56 = vsel %vm572_vm5, %v983_v4, %v985_v23 }
 0x24d   : > { %v994_v52 = vmul.f32 %v992_v56, %v2291_v37  ;;  %v995_v14 = vmul.f32 %v991_v6, %v2302_v41  ;;  %v1034_v6 = vld [vmem:[%s3088_s4] sm:$0xff]  ;;  %v1035_v56 = vld [vmem:[%s3088_s4 + $0x8] sm:$0xff] }
 0x24e   : > { %v1003_v59 = vpop.permute.xlu0 %1002 }
 0x24f   : > { %v1026_v28 = vpack.c.bf16 %v994_v52, %v978_v8  ;;  %v989_v36 = vpop.permute.xlu1 %988  ;;  %v1027_v45 = vpack.c.bf16 %v995_v14, %v979_v13 }
 0x250   : > { %v990_v11 = vsel %vm572_vm5, %v987_v5, %v989_v36  ;;  %v993_v46 = vsel %vm572_vm5, %v989_v36, %v983_v4 }
 0x251   : > { %v996_v38 = vmul.f32 %v990_v11, %v2305_v42  ;;  %v997_v22 = vmul.f32 %v993_v46, %v2299_v40  ;;  %1070 = vmatprep.subr.bf16.mxu0 %v1027_v45  ;;  %v1036_v45 = vpack.c.bf16 %v1035_v56, %v1034_v6 }
 0x252   : > { %1071 = vmatpush1.bf16.msra.mxu0 %v1026_v28 }
 0x253   : > { %v1028_v55 = vpack.c.bf16 %v996_v38, %v980_v49  ;;  %v1001_v63 = vpop.permute.xlu1 %1000  ;;  %v1029_v39 = vpack.c.bf16 %v997_v22, %v981_v18 }
 0x254   : > { %v1007_v5 = vsel %vm612_vm7, %v1001_v63, %v1003_v59  ;;  %v1008_v4 = vsel %vm612_vm7, %v999_v53, %v1001_v63 }
 0x255   : > { %v1010_v16 = vmul.f32 %v1008_v4, %v2318_v54  ;;  %v1011_v23 = vmul.f32 %v1007_v5, %v2338_v2  ;;  %1113 = vmatprep.subr.bf16.mxu1 %v1029_v39  ;;  %v1946_v2 = vld [vmem:[%s2024_s10 + $0x18] sm:$0xff]  ;;  %v1947_v54 = vld [vmem:[%s2024_s10 + $0x8] sm:$0xff] }
 0x256   : > { %1114 = vmatpush1.bf16.msra.mxu1 %v1028_v55  ;;  %v310_v40 = vsub.f32 %v1947_v54, %v1946_v2 }
 0x257   : > { %v1030_v8 = vpack.c.bf16 %v1010_v16, %v1010_v16  ;;  %v1031_v13 = vpack.c.bf16 %v1011_v23, %v1011_v23  ;;  %v1005_v52 = vpop.permute.xlu1 %1004 }
 0x258   : > { %v1006_v14 = vsel %vm612_vm7, %v1003_v59, %v1005_v52  ;;  %v1009_v15 = vsel %vm612_vm7, %v1005_v52, %v999_v53  ;;  %v312_v0 = vand.u32 2147483647, %v310_v40 }
 0x259   : > { %v1012_v27 = vmul.f32 %v1006_v14, %v2342_v33  ;;  %v1013_v28 = vmul.f32 %v1009_v15, %v2335_v3  ;;  %1902 = vmatprep.subr.msk.bf16.mxu0 %vm676_vm8, %v1031_v13  ;;  %v1053_v36 = vsel %vm676_vm8, %v1030_v8, 0 }
 0x25a   : > { %1073 = vmatpush1.bf16.msra.mxu0 %v1053_v36 }
 0x25b   : > { %v1032_v11 = vpack.c.bf16 %v1012_v27, %v1012_v27  ;;  %v1033_v46 = vpack.c.bf16 %v1013_v28, %v1013_v28 }
 0x25d   : > { %1903 = vmatmul.mubr.msk.bf16.vlgmr.msra.gmra.mrb[8].mxu0 %vm672_vm9, %v1036_v45  ;;  %1904 = vmatprep.subr.msk.bf16.mxu1 %vm676_vm8, %v1033_v46  ;;  %v1059_v49 = vsel %vm676_vm8, %v1032_v11, 0 }
 0x25e   : > { %1116 = vmatpush1.bf16.msra.mxu1 %v1059_v49 }
 0x25f   : > { %v1042_v4 = vpop.permute.xlu0 %1041 }
 0x261   : > { %1905 = vmatmul.mubr.msk.bf16.vlgmr.msra.gmra.mrb[8].mxu1 %vm672_vm9, %v1036_v45 }
 0x268   : > { %v1047_v23 = vpop.permute.xlu1 %1046 }
 0x282   : > { %v2562_v53 = vpop.f32.mrb[4].mxu1 }
 0x283   : > { %v2564_v18 = vpop.f32.mrb[4].mxu0  ;;  %v869_v38 = vpop.f32.mrb[5].mxu1 }
 0x284   : > { %v829_v59 = vpop.f32.mrb[5].mxu0  ;;  %v870_v55 = vpop.f32.mrb[6].mxu1  ;;  %v3142_v54 = vsub.f32 %v2564_v18, %v2562_v53 }
 0x285   : > { %v830_v63 = vpop.f32.mrb[6].mxu0  ;;  %v871_v39 = vpop.f32.mrb[7].mxu1 }
 0x286   : > { %v831_v5 = vpop.f32.mrb[7].mxu0  ;;  %v874_v2 = vand.u32 2147483647, %v3142_v54 }
 0x330   : > { %v1098_v16 = vpop.f32.mrb[8].mxu0 }
 0x331   : > { %v1099_v6 = vadd.f32 %v1098_v16, %v1042_v4  ;;  %v1100_v56 = vpop.f32.mrb[9].mxu0 }
 0x332   : > { %v1101_v8 = vadd.f32 %v1100_v56, %v1042_v4  ;;  %v1102_v13 = vpop.f32.mrb[10].mxu0 }
 0x333   : > { %v2568_v52 = vmax.f32 %v1099_v6, 0.0  ;;  %v1103_v14 = vadd.f32 %v1102_v13, %v1047_v23  ;;  %v1104_v15 = vpop.f32.mrb[11].mxu0 }
 0x334   : > { %v1105_v27 = vadd.f32 %v1104_v15, %v1047_v23  ;;  %v1141_v28 = vpop.f32.mrb[8].mxu1  ;;  %v2572_v46 = vmax.f32 %v1101_v8, 0.0 }
 0x335   : > { %v1154_v36 = vmax.f32 %v1103_v14, 0.0  ;;  %v1142_v45 = vadd.f32 %v1141_v28, %v1042_v4  ;;  %v1143_v11 = vpop.f32.mrb[9].mxu1  ;;  %1281 = vrot.lane.b32.xlu0 %v2568_v52, %s1956_s11 }
 0x336   : > { %v2574_v49 = vmax.f32 %v1105_v27, 0.0  ;;  %v1144_v38 = vadd.f32 %v1143_v11, %v1042_v4  ;;  %v1145_v59 = vpop.f32.mrb[10].mxu1 }
 0x337   : > { %v1152_v55 = vmax.f32 %v1142_v45, 0.0  ;;  %v1146_v63 = vadd.f32 %v1145_v59, %v1047_v23  ;;  %v1147_v39 = vpop.f32.mrb[11].mxu1  ;;  %1283 = vrot.lane.b32.xlu1 %v1154_v36, %s1956_s11  ;;  %v2578_v5 = vpack.c.bf16 %v1154_v36, %v2568_v52 }
 0x338   : > { %v2580_v16 = vmax.f32 %v1144_v38, 0.0  ;;  %v1148_v6 = vadd.f32 %v1147_v39, %v1047_v23  ;;  %v2584_v56 = vpack.c.bf16 %v2574_v49, %v2572_v46 }
 0x339   : > { %3139 = vst [vmem:[#allocation15_spill] sm:$0xff] %v2578_v5  ;;  %v1156_v8 = vmax.f32 %v1146_v63, 0.0  ;;  %1289 = vrot.lane.b32.xlu0 %v1152_v55, %s1956_s11  ;;  %v1158_v4 = vsub.f32 %v2568_v52, %v1152_v55 }
 0x33a   : > { %v2588_v13 = vmax.f32 %v1148_v6, 0.0  ;;  %1182 = vmatprep.subr.bf16.mxu0 %v2584_v56  ;;  %1214 = vmatprep.mubr.bf16.mxu0 %v2584_v56  ;;  %v1159_v14 = vsub.f32 %v2572_v46, %v2580_v16 }
 0x33b   : > { %1291 = vrot.lane.b32.xlu1 %v1156_v8, %s1956_s11  ;;  %1183 = vmatpush1.bf16.xpose.msra.mxu0 %v2578_v5  ;;  %v2596_v23 = vpack.c.bf16 %v1156_v8, %v1152_v55  ;;  %v1160_v15 = vsub.f32 %v1154_v36, %v1156_v8  ;;  %v1162_v27 = vand.u32 2147483647, %v1158_v4 }
 0x33c   : > { %v2600_v28 = vpack.c.bf16 %v2588_v13, %v2580_v16  ;;  %v1163_v45 = vand.u32 2147483647, %v1159_v14  ;;  %v1161_v40 = vsub.f32 %v2574_v49, %v2588_v13 }
 0x33d   : > { %3140 = vst [vmem:[#allocation16_spill] sm:$0xff] %v2596_v23  ;;  %1313 = vrot.lane.b32.xlu0 %v2568_v52, %s1957_s12  ;;  %v1164_v11 = vand.u32 2147483647, %v1160_v15  ;;  %v1575_v15 = vld [vmem:[%s3091_s7] sm:$0xff] }
 0x33e   : > { %1223 = vmatprep.subr.bf16.mxu1 %v2600_v28  ;;  %1255 = vmatprep.mubr.bf16.mxu1 %v2600_v28  ;;  %v1166_v38 = vadd.f32 %v1163_v45, %v1162_v27  ;;  %v1576_v27 = vld [vmem:[%s3091_s7 + $0x8] sm:$0xff] }
 0x33f   : > { %1224 = vmatpush1.bf16.xpose.msra.mxu1 %v2596_v23  ;;  %1315 = vrot.lane.b32.xlu1 %v1154_v36, %s1957_s12 }
 0x340   : > { %v2608_v59 = vadd.f32 %v1166_v38, %v1164_v11 }
 0x341   : > { %1321 = vrot.lane.b32.xlu0 %v1152_v55, %s1957_s12 }
 0x342   : > { %1215 = vmatmul.mubr.bf16.vlgmr.msra.gmra.mrb[12].mxu0 %v2578_v5  ;;  %v775_v5 = vsub.f32 %v2362_v31, %v2364_v32  ;;  %v876_v31 = vsel %vm875_vm11, %v874_v2, 0.0  ;;  %v1165_v32 = vand.u32 2147483647, %v1161_v40 }
 0x343   : > { %1323 = vrot.lane.b32.xlu1 %v1156_v8, %s1957_s12 }
 0x344   : > { %v1168_v53 = vadd.f32 %v2608_v59, %v1165_v32 }
 0x345   : > { %1345 = vrot.lane.b32.xlu0 %v2568_v52, %s1958_s13 }
 0x346   : > { %1256 = vmatmul.mubr.bf16.vlgmr.msra.gmra.mrb[12].mxu1 %v2596_v23 }
 0x347   : > { %1347 = vrot.lane.b32.xlu1 %v1154_v36, %s1958_s13 }
 0x349   : > { %1353 = vrot.lane.b32.xlu0 %v1152_v55, %s1958_s13 }
 0x34b   : > { %1355 = vrot.lane.b32.xlu1 %v1156_v8, %s1958_s13 }
 0x34d   : > { %1377 = vrot.lane.b32.xlu0 %v2568_v52, %s1959_s14 }
 0x34f   : > { %1379 = vrot.lane.b32.xlu1 %v1154_v36, %s1959_s14 }
 0x351   : > { %1385 = vrot.lane.b32.xlu0 %v1152_v55, %s1959_s14 }
 0x353   : > { %1387 = vrot.lane.b32.xlu1 %v1156_v8, %s1959_s14 }
 0x355   : > { %1409 = vrot.lane.b32.xlu0 %v2568_v52, %s1960_s15 }
 0x357   : > { %1411 = vrot.lane.b32.xlu1 %v1154_v36, %s1960_s15 }
 0x359   : > { %1417 = vrot.lane.b32.xlu0 %v1152_v55, %s1960_s15 }
 0x35b   : > { %1419 = vrot.lane.b32.xlu1 %v1156_v8, %s1960_s15 }
 0x35d   : > { %1441 = vrot.lane.b32.xlu0 %v2568_v52, %s1961_s16 }
 0x35f   : > { %1443 = vrot.lane.b32.xlu1 %v1154_v36, %s1961_s16 }
 0x361   : > { %1449 = vrot.lane.b32.xlu0 %v1152_v55, %s1961_s16 }
 0x363   : > { %1451 = vrot.lane.b32.xlu1 %v1156_v8, %s1961_s16 }
 0x365   : > { %1473 = vrot.lane.b32.xlu0 %v2568_v52, %s1962_s17 }
 0x367   : > { %1475 = vrot.lane.b32.xlu1 %v1154_v36, %s1962_s17 }
 0x369   : > { %1481 = vrot.lane.b32.xlu0 %v1152_v55, %s1962_s17 }
 0x36b   : > { %1483 = vrot.lane.b32.xlu1 %v1156_v8, %s1962_s17 }
 0x36d   : > { %1505 = vrot.lane.b32.xlu0 %v2568_v52, %s1964_s18 }
 0x36f   : > { %1507 = vrot.lane.b32.xlu1 %v1154_v36, %s1964_s18  ;;  %v1570_v36 = vld [vmem:[%s3090_s6 + $0x8] sm:$0xff] }
 0x371   : > { %1513 = vrot.lane.b32.xlu0 %v1152_v55, %s1964_s18  ;;  %v1572_v55 = vld [vmem:[%s3090_s6 + $0x18] sm:$0xff] }
 0x372   : > { %v1574_v39 = vpack.c.bf16 %v1572_v55, %v1570_v36 }
 0x373   : > { %1515 = vrot.lane.b32.xlu1 %v1156_v8, %s1964_s18 }
 0x374   : > { %1906 = vmatprep.mubr.msk.bf16.mxu0 %vm1268_vm10, %v1574_v39  ;;  %1907 = vmatprep.mubr.msk.bf16.mxu1 %vm1268_vm10, %v1574_v39 }
 0x375   : > { %1285 = vrot.lane.b32.xlu0 %v2572_v46, %s1956_s11 }
 0x377   : > { %1287 = vrot.lane.b32.xlu1 %v2574_v49, %s1956_s11 }
 0x379   : > { %1293 = vrot.lane.b32.xlu0 %v2580_v16, %s1956_s11 }
 0x37b   : > { %1295 = vrot.lane.b32.xlu1 %v2588_v13, %s1956_s11 }
 0x37d   : > { %1317 = vrot.lane.b32.xlu0 %v2572_v46, %s1957_s12 }
 0x37f   : > { %1319 = vrot.lane.b32.xlu1 %v2574_v49, %s1957_s12 }
 0x381   : > { %1325 = vrot.lane.b32.xlu0 %v2580_v16, %s1957_s12 }
 0x383   : > { %1327 = vrot.lane.b32.xlu1 %v2588_v13, %s1957_s12  ;;  %s303_s12 = scalar_lea.vmem %s3092_s8, %s1890_s23 }
 0x385   : > { %1349 = vrot.lane.b32.xlu0 %v2572_v46, %s1958_s13 }
 0x387   : > { %1351 = vrot.lane.b32.xlu1 %v2574_v49, %s1958_s13 }
 0x389   : > { %1357 = vrot.lane.b32.xlu0 %v2580_v16, %s1958_s13 }
 0x38b   : > { %1359 = vrot.lane.b32.xlu1 %v2588_v13, %s1958_s13 }
 0x38d   : > { %1381 = vrot.lane.b32.xlu0 %v2572_v46, %s1959_s14 }
 0x38f   : > { %1383 = vrot.lane.b32.xlu1 %v2574_v49, %s1959_s14 }
 0x391   : > { %1389 = vrot.lane.b32.xlu0 %v2580_v16, %s1959_s14 }
 0x393   : > { %1391 = vrot.lane.b32.xlu1 %v2588_v13, %s1959_s14 }
 0x395   : > { %1413 = vrot.lane.b32.xlu0 %v2572_v46, %s1960_s15 }
 0x397   : > { %1415 = vrot.lane.b32.xlu1 %v2574_v49, %s1960_s15 }
 0x399   : > { %1421 = vrot.lane.b32.xlu0 %v2580_v16, %s1960_s15 }
 0x39b   : > { %1423 = vrot.lane.b32.xlu1 %v2588_v13, %s1960_s15 }
 0x39d   : > { %1445 = vrot.lane.b32.xlu0 %v2572_v46, %s1961_s16 }
 0x39f   : > { %1447 = vrot.lane.b32.xlu1 %v2574_v49, %s1961_s16 }
 0x3a1   : > { %1453 = vrot.lane.b32.xlu0 %v2580_v16, %s1961_s16 }
 0x3a3   : > { %1455 = vrot.lane.b32.xlu1 %v2588_v13, %s1961_s16 }
 0x3a5   : > { %1477 = vrot.lane.b32.xlu0 %v2572_v46, %s1962_s17 }
 0x3a7   : > { %1479 = vrot.lane.b32.xlu1 %v2574_v49, %s1962_s17  ;;  %v2696_v52 = vpop.permute.xlu0 %1281 }
 0x3a9   : > { %v2704_v63 = vpop.permute.xlu1 %1283  ;;  %1485 = vrot.lane.b32.xlu0 %v2580_v16, %s1962_s17 }
 0x3ab   : > { %1487 = vrot.lane.b32.xlu1 %v2588_v13, %s1962_s17  ;;  %v2710_v6 = vpop.permute.xlu0 %1289 }
 0x3ad   : > { %v2714_v8 = vpop.permute.xlu1 %1291  ;;  %1509 = vrot.lane.b32.xlu0 %v2572_v46, %s1964_s18 }
 0x3af   : > { %1511 = vrot.lane.b32.xlu1 %v2574_v49, %s1964_s18  ;;  %v2720_v4 = vpop.permute.xlu0 %1313 }
 0x3b1   : > { %v2722_v14 = vpop.permute.xlu1 %1315  ;;  %1517 = vrot.lane.b32.xlu0 %v2580_v16, %s1964_s18 }
 0x3b3   : > { %1519 = vrot.lane.b32.xlu1 %v2588_v13, %s1964_s18  ;;  %v2731_v46 = vpop.permute.xlu0 %1321 }
 0x3b5   : > { %v2736_v45 = vpop.permute.xlu1 %1323  ;;  %1579 = vperm.xlu0 %1942, %v1575_v15   ;;  %v1944_v15 = vld [vmem:[%s2024_s10 + $0x10] sm:$0xff] }
 0x3b7   : > { %1584 = vperm.xlu1 %1943, %v1576_v27   ;;  %v2738_v16 = vpop.permute.xlu0 %1345  ;;  %v1945_v27 = vld [vmem:[%s2024_s10] sm:$0xff] }
 0x3b8   : > { %v309_v33 = vsub.f32 %v1945_v27, %v1944_v15  ;;  %v776_v15 = vsub.f32 %v2366_v44, %v2368_v17 }
 0x3b9   : > { %v2740_v11 = vpop.permute.xlu1 %1347 }
 0x3ba   : > { %v311_v37 = vand.u32 2147483647, %v309_v33  ;;  %v778_v33 = vand.u32 2147483647, %v776_v15 }
 0x3bb   : > { %v2742_v38 = vpop.permute.xlu0 %1353 }
 0x3bc   : > { %v313_v43 = vadd.f32 %v312_v0, %v311_v37  ;;  %v777_v37 = vand.u32 2147483647, %v775_v5 }
 0x3bd   : > { %v2744_v36 = vpop.permute.xlu1 %1355 }
 0x3be   : > { %v779_v17 = vadd.f32 %v778_v33, %v777_v37 }
 0x3bf   : > { %v2746_v55 = vpop.permute.xlu0 %1377 }
 0x3c1   : > { %v2748_v39 = vpop.permute.xlu1 %1379 }
 0x3c3   : > { %v2750_v22 = vpop.permute.xlu0 %1385 }
 0x3c5   : > { %v2752_v7 = vpop.permute.xlu1 %1387 }
 0x3c7   : > { %v2754_v3 = vpop.permute.xlu0 %1409 }
 0x3c9   : > { %v2760_v42 = vpop.permute.xlu1 %1411 }
 0x3cb   : > { %v2762_v41 = vpop.permute.xlu0 %1417 }
 0x3cd   : > { %v2764_v35 = vpop.permute.xlu1 %1419 }
 0x3cf   : > { %v2766_v1 = vpop.permute.xlu0 %1441 }
 0x3d1   : > { %v2768_v23 = vpop.permute.xlu1 %1443 }
 0x3d2   : > { %3141 = vst [vmem:[#allocation17_spill] sm:$0xff] %v2768_v23 }
 0x3d3   : > { %v2777_v27 = vpop.permute.xlu0 %1449 }
 0x3d4   : > { %314 = vadd.xlane.f32.xlu0 %v313_v43 }
 0x3d5   : > { %v2781_v0 = vpop.permute.xlu1 %1451 }
 0x3d7   : > { %v2783_v23 = vpop.permute.xlu0 %1473 }
 0x3d8   : > { %877 = vadd.xlane.f32.xlu0 %v876_v31 }
 0x3d9   : > { %v2785_v44 = vpop.permute.xlu1 %1475 }
 0x3db   : > { %v2788_v18 = vpop.permute.xlu0 %1481  ;;  %780 = vadd.xlane.f32.xlu1 %v779_v17 }
 0x3dc   : > { %1169 = vadd.xlane.f32.xlu0 %v1168_v53 }
 0x3dd   : > { %v2790_v43 = vpop.permute.xlu1 %1483 }
 0x3df   : > { %v2792_v49 = vpop.permute.xlu0 %1505 }
 0x3e0   : > { %3143 = vst [vmem:[#allocation18_spill] sm:$0xff] %v2792_v49 }
 0x3e1   : > { %v2794_v5 = vpop.permute.xlu1 %1507 }
 0x3e2   : > { %3144 = vst [vmem:[#allocation19_spill] sm:$0xff] %v2794_v5 }
 0x3e3   : > { %v2796_v13 = vpop.permute.xlu0 %1513 }
 0x3e4   : > { %3145 = vst [vmem:[#allocation20_spill] sm:$0xff] %v2796_v13 }
 0x3e5   : > { %v2798_v15 = vpop.permute.xlu1 %1515 }
 0x3e6   : > { %3146 = vst [vmem:[#allocation21_spill] sm:$0xff] %v2798_v15 }
 0x3e7   : > { %v1286_v54 = vpop.permute.xlu0 %1285 }
 0x3e8   : > { %v1299_v2 = vsel %vm333_vm0, %v1286_v54, %v2710_v6  ;;  %v1301_v59 = vsel %vm333_vm0, %v2696_v52, %v1286_v54 }
 0x3e9   : > { %v1288_v40 = vpop.permute.xlu1 %1287  ;;  %v1306_v31 = vmul.f32 %v1301_v59, %v2134_v19  ;;  %v1307_v32 = vmul.f32 %v1299_v2, %v2158_v30 }
 0x3ea   : > { %v1300_v37 = vsel %vm333_vm0, %v1288_v40, %v2714_v8  ;;  %v1302_v33 = vsel %vm333_vm0, %v2704_v63, %v1288_v40 }
 0x3eb   : > { %v1310_v17 = vmul.f32 %v1302_v33, %v2134_v19  ;;  %v1311_v53 = vmul.f32 %v1300_v37, %v2158_v30  ;;  %v1294_v5 = vpop.permute.xlu0 %1293 }
 0x3ec   : > { %v1297_v54 = vsel %vm333_vm0, %v2710_v6, %v1294_v5  ;;  %v1303_v15 = vsel %vm333_vm0, %v1294_v5, %v2696_v52 }
 0x3ed   : > { %v1539_v49 = vpack.c.bf16 %v1311_v53, %v1307_v32  ;;  %v1296_v13 = vpop.permute.xlu1 %1295  ;;  %v1538_v40 = vpack.c.bf16 %v1310_v17, %v1306_v31  ;;  %v1305_v30 = vmul.f32 %v1303_v15, %v2142_v24  ;;  %v1308_v59 = vmul.f32 %v1297_v54, %v2148_v26 }
 0x3ee   : > { %v1298_v2 = vsel %vm333_vm0, %v2714_v8, %v1296_v13  ;;  %v1304_v19 = vsel %vm333_vm0, %v1296_v13, %v2704_v63 }
 0x3ef   : > { %v1309_v6 = vmul.f32 %v1304_v19, %v2142_v24  ;;  %v1312_v37 = vmul.f32 %v1298_v2, %v2148_v26  ;;  %v1318_v52 = vpop.permute.xlu0 %1317  ;;  %1590 = vmatprep.subr.bf16.mxu0 %v1538_v40 }
 0x3f0   : > { %v1331_v5 = vsel %vm372_vm1, %v1318_v52, %v2731_v46  ;;  %v1333_v8 = vsel %vm372_vm1, %v2720_v4, %v1318_v52 }
 0x3f1   : > { %v1537_v33 = vpack.c.bf16 %v1309_v6, %v1305_v30  ;;  %v1320_v63 = vpop.permute.xlu1 %1319  ;;  %v1540_v13 = vpack.c.bf16 %v1312_v37, %v1308_v59  ;;  %v1338_v15 = vmul.f32 %v1333_v8, %v2137_v20  ;;  %v1339_v31 = vmul.f32 %v1331_v5, %v2165_v34 }
 0x3f2   : > { %v1332_v24 = vsel %vm372_vm1, %v1320_v63, %v2736_v45  ;;  %v1334_v26 = vsel %vm372_vm1, %v2722_v14, %v1320_v63 }
 0x3f3   : > { %v1342_v32 = vmul.f32 %v1334_v26, %v2137_v20  ;;  %v1343_v17 = vmul.f32 %v1332_v24, %v2165_v34  ;;  %1633 = vmatprep.subr.bf16.mxu1 %v1540_v13  ;;  %v1326_v53 = vpop.permute.xlu0 %1325  ;;  %1591 = vmatpush1.bf16.msra.mxu0 %v1537_v33 }
 0x3f4   : > { %v1329_v54 = vsel %vm372_vm1, %v2731_v46, %v1326_v53  ;;  %v1335_v40 = vsel %vm372_vm1, %v1326_v53, %v2720_v4  ;;  %1634 = vmatpush1.bf16.msra.mxu1 %v1539_v49 }
 0x3f5   : > { %v1543_v2 = vpack.c.bf16 %v1343_v17, %v1339_v31  ;;  %v1328_v19 = vpop.permute.xlu1 %1327  ;;  %v1542_v30 = vpack.c.bf16 %v1342_v32, %v1338_v15  ;;  %v1337_v59 = vmul.f32 %v1335_v40, %v2145_v25  ;;  %v1340_v46 = vmul.f32 %v1329_v54, %v2155_v29 }
 0x3f6   : > { %v1330_v20 = vsel %vm372_vm1, %v2736_v45, %v1328_v19  ;;  %v1336_v34 = vsel %vm372_vm1, %v1328_v19, %v2722_v14 }
 0x3f7   : > { %v1341_v6 = vmul.f32 %v1336_v34, %v2145_v25  ;;  %v1344_v4 = vmul.f32 %v1330_v20, %v2155_v29  ;;  %v1350_v49 = vpop.permute.xlu0 %1349  ;;  %1592 = vmatprep.subr.bf16.mxu0 %v1542_v30 }
 0x3f8   : > { %v1363_v37 = vsel %vm412_vm2, %v1350_v49, %v2742_v38  ;;  %v1365_v45 = vsel %vm412_vm2, %v2738_v16, %v1350_v49 }
 0x3f9   : > { %v1541_v52 = vpack.c.bf16 %v1341_v6, %v1337_v59  ;;  %v1352_v14 = vpop.permute.xlu1 %1351  ;;  %v1544_v5 = vpack.c.bf16 %v1344_v4, %v1340_v46  ;;  %v1370_v8 = vmul.f32 %v1365_v45, %v2189_v57  ;;  %v1371_v33 = vmul.f32 %v1363_v37, %v2201_v61 }
 0x3fa   : > { %v1364_v25 = vsel %vm412_vm2, %v1352_v14, %v2744_v36  ;;  %v1366_v29 = vsel %vm412_vm2, %v2740_v11, %v1352_v14 }
 0x3fb   : > { %v1374_v63 = vmul.f32 %v1366_v29, %v2189_v57  ;;  %v1375_v13 = vmul.f32 %v1364_v25, %v2201_v61  ;;  %1635 = vmatprep.subr.bf16.mxu1 %v1544_v5  ;;  %v1358_v15 = vpop.permute.xlu0 %1357  ;;  %1593 = vmatpush1.bf16.msra.mxu0 %v1541_v52 }
 0x3fc   : > { %v1361_v24 = vsel %vm412_vm2, %v2742_v38, %v1358_v15  ;;  %v1367_v26 = vsel %vm412_vm2, %v1358_v15, %v2738_v16  ;;  %1636 = vmatpush1.bf16.msra.mxu1 %v1543_v2 }
 0x3fd   : > { %v1547_v31 = vpack.c.bf16 %v1375_v13, %v1371_v33  ;;  %v1360_v32 = vpop.permute.xlu1 %1359  ;;  %v1546_v17 = vpack.c.bf16 %v1374_v63, %v1370_v8  ;;  %v1369_v53 = vmul.f32 %v1367_v26, %v2198_v60  ;;  %v1372_v38 = vmul.f32 %v1361_v24, %v2204_v62 }
 0x3fe   : > { %v1362_v57 = vsel %vm412_vm2, %v2744_v36, %v1360_v32  ;;  %v1368_v61 = vsel %vm412_vm2, %v1360_v32, %v2740_v11 }
 0x3ff   : > { %v1373_v54 = vmul.f32 %v1368_v61, %v2198_v60  ;;  %v1376_v16 = vmul.f32 %v1362_v57, %v2204_v62  ;;  %v1382_v40 = vpop.permute.xlu0 %1381  ;;  %1594 = vmatprep.subr.bf16.mxu0 %v1546_v17 }
 0x400   : > { %v1395_v2 = vsel %vm452_vm3, %v1382_v40, %v2750_v22  ;;  %v1397_v36 = vsel %vm452_vm3, %v2746_v55, %v1382_v40 }
 0x401   : > { %v1545_v19 = vpack.c.bf16 %v1373_v54, %v1369_v53  ;;  %v1384_v11 = vpop.permute.xlu1 %1383  ;;  %v1548_v30 = vpack.c.bf16 %v1376_v16, %v1372_v38  ;;  %v1402_v20 = vmul.f32 %v1397_v36, %v2193_v58  ;;  %v1403_v34 = vmul.f32 %v1395_v2, %v2214_v12  ;;  %v3147_v38 = vld [vmem:[#allocation15_spill] sm:$0xff]  ;;  %v3149_v2 = vld [vmem:[#allocation10_spill] sm:$0xff] }
 0x402   : > { %v1396_v60 = vsel %vm452_vm3, %v1384_v11, %v2752_v7  ;;  %v1398_v62 = vsel %vm452_vm3, %v2748_v39, %v1384_v11 }
 0x403   : > { %v1406_v59 = vmul.f32 %v1398_v62, %v2193_v58  ;;  %v1407_v46 = vmul.f32 %v1396_v60, %v2214_v12  ;;  %1637 = vmatprep.subr.bf16.mxu1 %v1548_v30  ;;  %v1390_v6 = vpop.permute.xlu0 %1389  ;;  %1595 = vmatpush1.bf16.msra.mxu0 %v1545_v19  ;;  %v3150_v19 = vld [vmem:[#allocation17_spill] sm:$0xff]  ;;  %v3151_v30 = vld [vmem:[#allocation4_spill] sm:$0xff] }
 0x404   : > { %v1393_v4 = vsel %vm452_vm3, %v2750_v22, %v1390_v6  ;;  %v1399_v49 = vsel %vm452_vm3, %v1390_v6, %v2746_v55  ;;  %1638 = vmatpush1.bf16.msra.mxu1 %v1547_v31 }
 0x405   : > { %v1551_v37 = vpack.c.bf16 %v1407_v46, %v1403_v34  ;;  %v1392_v45 = vpop.permute.xlu1 %1391  ;;  %v1550_v52 = vpack.c.bf16 %v1406_v59, %v1402_v20  ;;  %v1401_v14 = vmul.f32 %v1399_v49, %v2211_v9  ;;  %v1404_v22 = vmul.f32 %v1393_v4, %v2221_v21 }
 0x406   : > { %v1394_v58 = vsel %vm452_vm3, %v2752_v7, %v1392_v45  ;;  %v1400_v12 = vsel %vm452_vm3, %v1392_v45, %v2748_v39 }
 0x407   : > { %v1405_v5 = vmul.f32 %v1400_v12, %v2211_v9  ;;  %v1408_v55 = vmul.f32 %v1394_v58, %v2221_v21  ;;  %v1414_v8 = vpop.permute.xlu0 %1413  ;;  %1596 = vmatprep.subr.bf16.mxu0 %v1550_v52  ;;  %v3152_v12 = vld [vmem:[#allocation5_spill] sm:$0xff] }
 0x408   : > { %v1427_v25 = vsel %vm492_vm4, %v1414_v8, %v2762_v41  ;;  %v1429_v9 = vsel %vm492_vm4, %v2754_v3, %v1414_v8 }
 0x409   : > { %v1549_v29 = vpack.c.bf16 %v1405_v5, %v1401_v14  ;;  %v1416_v7 = vpop.permute.xlu1 %1415  ;;  %v1552_v33 = vpack.c.bf16 %v1408_v55, %v1404_v22  ;;  %v1434_v21 = vmul.f32 %v1427_v25, %v2250_v50  ;;  %v1433_v17 = vmul.f32 %v1429_v9, %v2242_v47  ;;  %v3153_v14 = vld [vmem:[#allocation3_spill] sm:$0xff] }
 0x40a   : > { %v1428_v39 = vsel %vm492_vm4, %v1416_v7, %v2764_v35  ;;  %v1430_v63 = vsel %vm492_vm4, %v2760_v42, %v1416_v7 }
 0x40b   : > { %v1438_v13 = vmul.f32 %v1428_v39, %v2250_v50  ;;  %1639 = vmatprep.subr.bf16.mxu1 %v1552_v33  ;;  %v1422_v15 = vpop.permute.xlu0 %1421  ;;  %1597 = vmatpush1.bf16.msra.mxu0 %v1549_v29  ;;  %v1437_v31 = vmul.f32 %v1430_v63, %v2242_v47 }
 0x40c   : > { %v1425_v24 = vsel %vm492_vm4, %v2762_v41, %v1422_v15  ;;  %v1431_v26 = vsel %vm492_vm4, %v1422_v15, %v2754_v3  ;;  %1598 = vmatprep.subr.bf16.mxu0 %v2584_v56  ;;  %1640 = vmatpush1.bf16.msra.mxu1 %v1551_v37 }
 0x40d   : > { %v1424_v32 = vpop.permute.xlu1 %1423  ;;  %1641 = vmatprep.subr.bf16.mxu1 %v2600_v28  ;;  %v1554_v50 = vpack.c.bf16 %v1438_v13, %v1434_v21  ;;  %v1435_v3 = vmul.f32 %v1425_v24, %v2253_v51  ;;  %v1436_v56 = vmul.f32 %v1431_v26, %v2245_v48  ;;  %v1553_v54 = vpack.c.bf16 %v1437_v31, %v1433_v17  ;;  %v3154_v24 = vld [vmem:[#allocation6_spill] sm:$0xff]  ;;  %v3155_v31 = vld [vmem:[#allocation8_spill] sm:$0xff] }
 0x40e   : > { %v1426_v57 = vsel %vm492_vm4, %v2764_v35, %v1424_v32  ;;  %v1432_v41 = vsel %vm492_vm4, %v1424_v32, %v2760_v42  ;;  %v3148_v42 = vld [vmem:[#allocation16_spill] sm:$0xff] }
 0x40f   : > { %v1439_v61 = vmul.f32 %v1426_v57, %v2253_v51  ;;  %v1440_v53 = vmul.f32 %v1432_v41, %v2245_v48  ;;  %v1446_v28 = vpop.permute.xlu0 %1445  ;;  %1599 = vmatpush1.bf16.msra.mxu0 %v3147_v38 }
 0x410   : > { %v1459_v47 = vsel %vm532_vm6, %v1446_v28, %v2777_v27  ;;  %v1461_v35 = vsel %vm532_vm6, %v2766_v1, %v1446_v28  ;;  %1600 = vmatprep.subr.bf16.mxu0 %v1554_v50  ;;  %1642 = vmatpush1.bf16.msra.mxu1 %v3148_v42 }
 0x411   : > { %v1555_v16 = vpack.c.bf16 %v1439_v61, %v1435_v3  ;;  %v1448_v40 = vpop.permute.xlu1 %1447  ;;  %v1556_v51 = vpack.c.bf16 %v1440_v53, %v1436_v56  ;;  %v1465_v48 = vmul.f32 %v1461_v35, %v3149_v2  ;;  %v1466_v20 = vmul.f32 %v1459_v47, %v3151_v30 }
 0x412   : > { %v1460_v36 = vsel %vm532_vm6, %v1448_v40, %v2781_v0  ;;  %v1462_v11 = vsel %vm532_vm6, %v3150_v19, %v1448_v40 }
 0x413   : > { %v1469_v60 = vmul.f32 %v1462_v11, %v3149_v2  ;;  %v1470_v62 = vmul.f32 %v1460_v36, %v3151_v30  ;;  %1643 = vmatprep.subr.bf16.mxu1 %v1556_v51  ;;  %v1454_v34 = vpop.permute.xlu0 %1453  ;;  %1601 = vmatpush1.bf16.msra.mxu0 %v1553_v54  ;;  %v3157_v51 = vld [vmem:[#allocation7_spill] sm:$0xff]  ;;  %v3158_v11 = vld [vmem:[#allocation20_spill] sm:$0xff]  ;;  %v3159_v30 = vld [vmem:[#allocation18_spill] sm:$0xff] }
 0x414   : > { %v1457_v59 = vsel %vm532_vm6, %v2777_v27, %v1454_v34  ;;  %v1463_v46 = vsel %vm532_vm6, %v1454_v34, %v2766_v1  ;;  %1644 = vmatpush1.bf16.msra.mxu1 %v1555_v16 }
 0x415   : > { %v1557_v6 = vpack.c.bf16 %v1469_v60, %v1465_v48  ;;  %v1456_v4 = vpop.permute.xlu1 %1455  ;;  %v1216_v49 = vpop.f32.mrb[12].mxu0  ;;  %v1558_v37 = vpack.c.bf16 %v1470_v62, %v1466_v20  ;;  %v1467_v27 = vmul.f32 %v1457_v59, %v3152_v12  ;;  %v1468_v22 = vmul.f32 %v1463_v46, %v3153_v14  ;;  %v3160_v59 = vld [vmem:[#allocation21_spill] sm:$0xff] }
 0x416   : > { %v1458_v45 = vsel %vm532_vm6, %v2781_v0, %v1456_v4  ;;  %v1464_v52 = vsel %vm532_vm6, %v1456_v4, %v3150_v19  ;;  %v1218_v58 = vpop.f32.mrb[13].mxu0 }
 0x417   : > { %v1471_v1 = vmul.f32 %v1458_v45, %v3152_v12  ;;  %v1472_v5 = vmul.f32 %v1464_v52, %v3153_v14  ;;  %v1478_v55 = vpop.permute.xlu0 %1477  ;;  %v1219_v8 = vpop.f32.mrb[14].mxu0  ;;  %1602 = vmatprep.subr.bf16.mxu0 %v1558_v37  ;;  %v3162_v37 = vld [vmem:[#allocation11_spill] sm:$0xff]  ;;  %v3163_v52 = vld [vmem:[#allocation13_spill] sm:$0xff] }
 0x418   : > { %v1491_v0 = vsel %vm572_vm5, %v1478_v55, %v2788_v18  ;;  %v1493_v25 = vsel %vm572_vm5, %v2783_v23, %v1478_v55  ;;  %v1221_v29 = vpop.f32.mrb[15].mxu0  ;;  %1603 = vmatpush1.bf16.msra.mxu0 %v1557_v6  ;;  %v3161_v6 = vld [vmem:[#allocation19_spill] sm:$0xff] }
 0x419   : > { %v1559_v7 = vpack.c.bf16 %v1471_v1, %v1467_v27  ;;  %v1257_v33 = vpop.f32.mrb[12].mxu1  ;;  %v1480_v39 = vpop.permute.xlu1 %1479  ;;  %v1560_v63 = vpack.c.bf16 %v1472_v5, %v1468_v22  ;;  %v1497_v26 = vmul.f32 %v1493_v25, %v3154_v24  ;;  %v1498_v32 = vmul.f32 %v1491_v0, %v3155_v31  ;;  %v1569_v22 = vld [vmem:[%s3090_s6] sm:$0xff]  ;;  %v1571_v1 = vld [vmem:[%s3090_s6 + $0x10] sm:$0xff] }
 0x41a   : > { %v1264_v9 = vsub.f32 %v1216_v49, %v1257_v33  ;;  %v1492_v21 = vsel %vm572_vm5, %v1480_v39, %v2790_v43  ;;  %v1494_v13 = vsel %vm572_vm5, %v2785_v44, %v1480_v39  ;;  %v1259_v15 = vpop.f32.mrb[13].mxu1  ;;  %v1573_v33 = vpack.c.bf16 %v1571_v1, %v1569_v22  ;;  %v3164_v39 = vld [vmem:[#allocation14_spill] sm:$0xff] }
 0x41b   : > { %v1501_v50 = vmul.f32 %v1494_v13, %v3154_v24  ;;  %v1502_v17 = vmul.f32 %v1492_v21, %v3155_v31  ;;  %v1260_v57 = vpop.f32.mrb[14].mxu1  ;;  %1645 = vmatprep.subr.bf16.mxu1 %v1560_v63  ;;  %v1486_v41 = vpop.permute.xlu0 %1485 }
 0x41c   : > { %v1265_v3 = vsub.f32 %v1219_v8, %v1260_v57  ;;  %v1489_v56 = vsel %vm572_vm5, %v2788_v18, %v1486_v41  ;;  %v1495_v61 = vsel %vm572_vm5, %v1486_v41, %v2783_v23  ;;  %v1262_v53 = vpop.f32.mrb[15].mxu1  ;;  %1646 = vmatpush1.bf16.msra.mxu1 %v1559_v7  ;;  %v1266_v28 = vand.u32 2147483647, %v1264_v9  ;;  %v3156_v18 = vld [vmem:[#allocation9_spill] sm:$0xff]  ;;  %v3165_v9 = vld [vmem:[#allocation12_spill] sm:$0xff] }
 0x41d   : > { %v1561_v38 = vpack.c.bf16 %v1501_v50, %v1497_v26  ;;  %v1488_v47 = vpop.permute.xlu1 %1487  ;;  %v1562_v35 = vpack.c.bf16 %v1502_v17, %v1498_v32  ;;  %v1499_v40 = vmul.f32 %v1489_v56, %v3156_v18  ;;  %v1500_v2 = vmul.f32 %v1495_v61, %v3157_v51 }
 0x41e   : > { %v1267_v42 = vand.u32 2147483647, %v1265_v3  ;;  %v1490_v54 = vsel %vm572_vm5, %v2790_v43, %v1488_v47  ;;  %v1496_v16 = vsel %vm572_vm5, %v1488_v47, %v2785_v44  ;;  %v1269_v20 = vsel %vm1268_vm10, %v1266_v28, 0.0 }
 0x41f   : > { %v1503_v23 = vmul.f32 %v1490_v54, %v3156_v18  ;;  %v1504_v48 = vmul.f32 %v1496_v16, %v3157_v51  ;;  %v1510_v36 = vpop.permute.xlu0 %1509  ;;  %1604 = vmatprep.subr.bf16.mxu0 %v1562_v35 }
 0x420   : > { %v1270_v19 = vsel %vm1268_vm10, %v1267_v42, 0.0  ;;  %v1523_v43 = vsel %vm612_vm7, %v1510_v36, %v3158_v11  ;;  %v1525_v44 = vsel %vm612_vm7, %v3159_v30, %v1510_v36  ;;  %1605 = vmatpush1.bf16.msra.mxu0 %v1561_v38 }
 0x421   : > { %v1563_v60 = vpack.c.bf16 %v1503_v23, %v1499_v40  ;;  %v1512_v62 = vpop.permute.xlu1 %1511  ;;  %v1564_v34 = vpack.c.bf16 %v1504_v48, %v1500_v2  ;;  %v1271_v49 = vadd.f32 %v1270_v19, %v1269_v20  ;;  %v1529_v45 = vmul.f32 %v1525_v44, %v3162_v37 }
 0x422   : > { %v1524_v46 = vsel %vm612_vm7, %v1512_v62, %v3160_v59  ;;  %v1526_v4 = vsel %vm612_vm7, %v3161_v6, %v1512_v62  ;;  %v1530_v58 = vmul.f32 %v1523_v43, %v3163_v52 }
 0x423   : > { %v1533_v12 = vmul.f32 %v1526_v4, %v3162_v37  ;;  %v1534_v27 = vmul.f32 %v1524_v46, %v3163_v52  ;;  %1647 = vmatprep.subr.bf16.mxu1 %v1564_v34  ;;  %v1518_v14 = vpop.permute.xlu0 %1517  ;;  %1272 = vadd.xlane.f32.xlu1 %v1271_v49 }
 0x424   : > { %v1521_v5 = vsel %vm612_vm7, %v3158_v11, %v1518_v14  ;;  %v1527_v55 = vsel %vm612_vm7, %v1518_v14, %v3159_v30  ;;  %1648 = vmatpush1.bf16.msra.mxu1 %v1563_v60 }
 0x425   : > { %v1565_v8 = vpack.c.bf16 %v1533_v12, %v1529_v45  ;;  %v1520_v0 = vpop.permute.xlu1 %1519  ;;  %v1566_v25 = vpack.c.bf16 %v1534_v27, %v1530_v58  ;;  %v1531_v63 = vmul.f32 %v1521_v5, %v3164_v39  ;;  %v1532_v21 = vmul.f32 %v1527_v55, %v3165_v9 }
 0x426   : > { %v1522_v29 = vsel %vm612_vm7, %v3160_v59, %v1520_v0  ;;  %v1528_v7 = vsel %vm612_vm7, %v1520_v0, %v3161_v6 }
 0x427   : > { %v1535_v13 = vmul.f32 %v1522_v29, %v3164_v39  ;;  %v1536_v15 = vmul.f32 %v1528_v7, %v3165_v9  ;;  %1606 = vmatprep.subr.bf16.mxu0 %v1566_v25 }
 0x428   : > { %1607 = vmatpush1.bf16.msra.mxu0 %v1565_v8 }
 0x429   : > { %v1567_v24 = vpack.c.bf16 %v1535_v13, %v1531_v63  ;;  %v1568_v26 = vpack.c.bf16 %v1536_v15, %v1532_v21 }
 0x42b   : > { %1623 = vmatmul.mubr.bf16.vlgmr.msra.gmra.mrb[16].mxu0 %v1573_v33  ;;  %1649 = vmatprep.subr.bf16.mxu1 %v1568_v26 }
 0x42c   : > { %1650 = vmatpush1.bf16.msra.mxu1 %v1567_v24 }
 0x42f   : > { %1666 = vmatmul.mubr.bf16.vlgmr.msra.gmra.mrb[16].mxu1 %v1573_v33 }
 0x434   : > { %v1580_v31 = vpop.permute.xlu0 %1579 }
 0x436   : > { %v1585_v50 = vpop.permute.xlu1 %1584 }
 0x461   : > { %v315_v10 = vpop.xlane.xlu0 %314 }
 0x462   : > { %v316_v32 = vrot.slane %v315_v10, 4 }
 0x464   : > { %v317_v17 = vadd.f32 %v316_v32, %v315_v10 }
 0x465   : > { %v878_v57 = vpop.xlane.xlu0 %877 }
 0x466   : > { %v318_v41 = vrot.slane %v317_v17, 2  ;;  %v879_v3 = vrot.slane %v878_v57, 4 }
 0x468   : > { %v880_v56 = vadd.f32 %v879_v3, %v878_v57  ;;  %v781_v61 = vpop.xlane.xlu1 %780  ;;  %v319_v53 = vadd.f32 %v318_v41, %v317_v17 }
 0x469   : > { %v782_v28 = vrot.slane %v781_v61, 4  ;;  %v1170_v38 = vpop.xlane.xlu0 %1169 }
 0x46a   : > { %v881_v47 = vrot.slane %v880_v56, 2  ;;  %v1171_v35 = vrot.slane %v1170_v38, 4  ;;  %v320_v42 = vrot.slane %v319_v53, 1 }
 0x46b   : > { %v783_v54 = vadd.f32 %v782_v28, %v781_v61 }
 0x46c   : > { %v1172_v16 = vadd.f32 %v1171_v35, %v1170_v38  ;;  %v321_v18 = vadd.f32 %v320_v42, %v319_v53  ;;  %v882_v40 = vadd.f32 %v881_v47, %v880_v56 }
 0x46d   : > { %v784_v51 = vrot.slane %v783_v54, 2 }
 0x46e   : > { %v1173_v2 = vrot.slane %v1172_v16, 2  ;;  %1911 = vpush %v321_v18  ;;  %v883_v48 = vrot.slane %v882_v40, 1 }
 0x46f   : > { %v785_v23 = vadd.f32 %v784_v51, %v783_v54 }
 0x470   : > { %v1174_v36 = vadd.f32 %v1173_v2, %v1172_v16  ;;  %v884_v30 = vadd.f32 %v883_v48, %v882_v40 }
 0x471   : > { %v786_v19 = vrot.slane %v785_v23, 1 }
 0x472   : > { %v1175_v11 = vrot.slane %v1174_v36, 1 }
 0x473   : > { %v787_v43 = vadd.f32 %v786_v19, %v785_v23 }
 0x474   : > { %v1176_v44 = vadd.f32 %v1175_v11, %v1174_v36 }
 0x475   : > { %1913 = vpush %v787_v43 }
 0x476   : > { %1915 = vpush %v884_v30 }
 0x477   : > { %1917 = vpush %v1176_v44 }
 0x49f   : > { %s1912_s30 = spop %1911 }
 0x4a6   : > { %s1914_s9 = spop %1913 }
 0x4a7   : > { %s1916_s19 = spop %1915 }
 0x4a8   : > { %s1918_s20 = spop %1917 }
 0x4b0   : > { %v1273_v20 = vpop.xlane.xlu1 %1272 }
 0x4b1   : > { %v1274_v60 = vrot.slane %v1273_v20, 4 }
 0x4b3   : > { %v1275_v62 = vadd.f32 %v1274_v60, %v1273_v20 }
 0x4b5   : > { %v1276_v34 = vrot.slane %v1275_v62, 2 }
 0x4b7   : > { %v1277_v59 = vadd.f32 %v1276_v34, %v1275_v62 }
 0x4b9   : > { %v1278_v46 = vrot.slane %v1277_v59, 1 }
 0x4bb   : > { %v1279_v6 = vadd.f32 %v1278_v46, %v1277_v59 }
 0x4bd   : > { %1919 = vpush %v1279_v6 }
 0x4ee   : > { %s1920_s21 = spop %1919 }
 0x4fe   : > { %v1624_v4 = vpop.f32.mrb[16].mxu0 }
 0x4ff   : > { %v1625_v49 = vadd.f32 %v1624_v4, %v1580_v31  ;;  %v1626_v37 = vpop.f32.mrb[17].mxu0 }
 0x500   : > { %v1627_v45 = vadd.f32 %v1626_v37, %v1580_v31  ;;  %v1628_v52 = vpop.f32.mrb[18].mxu0 }
 0x501   : > { %v1629_v58 = vadd.f32 %v1628_v52, %v1585_v50  ;;  %v1630_v12 = vpop.f32.mrb[19].mxu0  ;;  %v1676_v22 = vmax.f32 %v1625_v49, 0.0  ;;  %v3166_v52 = vld [vmem:[#allocation2_spill] sm:$0xff] }
 0x502   : > { %v1631_v27 = vadd.f32 %v1630_v12, %v1585_v50  ;;  %v1667_v14 = vpop.f32.mrb[16].mxu1  ;;  %v1677_v8 = vmax.f32 %v1627_v45, 0.0  ;;  %vm1808_vm12 = vcmp.eq.s32.totalorder %v3166_v52, 0  ;;  %vm1811_vm13 = vcmp.eq.s32.totalorder %v3166_v52, 1 }
 0x503   : > { %v1680_v1 = vmax.f32 %v1629_v58, 0.0  ;;  %v1668_v5 = vadd.f32 %v1667_v14, %v1580_v31  ;;  %v1669_v55 = vpop.f32.mrb[17].mxu1  ;;  %v1809_v58 = vstv %s1912_s30  ;;  %vm1814_vm14 = vcmp.eq.s32.totalorder %v3166_v52, 2 }
 0x504   : > { %v1681_v0 = vmax.f32 %v1631_v27, 0.0  ;;  %v1670_v25 = vadd.f32 %v1669_v55, %v1580_v31  ;;  %v1671_v29 = vpop.f32.mrb[18].mxu1  ;;  %v1810_v12 = vsel %vm1808_vm12, %v1809_v58, 0.0  ;;  %v1812_v27 = vstv %s1914_s9 }
 0x505   : > { %v1704_v7 = vpack.c.bf16 %v1680_v1, %v1676_v22  ;;  %v1678_v33 = vmax.f32 %v1668_v5, 0.0  ;;  %v1672_v39 = vadd.f32 %v1671_v29, %v1585_v50  ;;  %v1673_v63 = vpop.f32.mrb[19].mxu1  ;;  %v1813_v14 = vsel %vm1811_vm13, %v1812_v27, %v1810_v12 }
 0x506   : > { %v1705_v9 = vpack.c.bf16 %v1681_v0, %v1677_v8  ;;  %v1679_v21 = vmax.f32 %v1670_v25, 0.0  ;;  %v1674_v13 = vadd.f32 %v1673_v63, %v1585_v50  ;;  %vm1817_vm15 = vcmp.eq.s32.totalorder %v3166_v52, 3 }
 0x507   : > { %v1684_v15 = vsub.f32 %v1676_v22, %v1678_v33  ;;  %v1682_v24 = vmax.f32 %v1672_v39, 0.0  ;;  %v1815_v22 = vstv %s1918_s20  ;;  %vm1820_vm0 = vcmp.eq.s32.totalorder %v3166_v52, 4 }
 0x508   : > { %v1685_v26 = vsub.f32 %v1677_v8, %v1679_v21  ;;  %v1683_v10 = vmax.f32 %v1674_v13, 0.0  ;;  %1708 = vmatprep.subr.bf16.mxu0 %v1705_v9  ;;  %1740 = vmatprep.mubr.bf16.mxu0 %v1705_v9  ;;  %v1816_v5 = vsel %vm1814_vm14, %v1815_v22, %v1813_v14  ;;  %v1821_v8 = vstv %s1916_s19 }
 0x509   : > { %v1688_v32 = vand.u32 2147483647, %v1684_v15  ;;  %v1686_v17 = vsub.f32 %v1680_v1, %v1682_v24  ;;  %v1706_v57 = vpack.c.bf16 %v1682_v24, %v1678_v33  ;;  %1709 = vmatpush1.bf16.xpose.msra.mxu0 %v1704_v7  ;;  %vm1823_vm1 = vcmp.eq.s32.totalorder %v3166_v52, 5 }
 0x50a   : > { %v1689_v41 = vand.u32 2147483647, %v1685_v26  ;;  %v1687_v31 = vsub.f32 %v1681_v0, %v1683_v10  ;;  %v1707_v3 = vpack.c.bf16 %v1683_v10, %v1679_v21  ;;  %vm1826_vm2 = vcmp.eq.s32.totalorder %v3166_v52, 6 }
 0x50b   : > { %v1690_v56 = vand.u32 2147483647, %v1686_v17  ;;  %v1824_v25 = vstv %s1920_s21 }
 0x50c   : > { %v1692_v61 = vadd.f32 %v1689_v41, %v1688_v32  ;;  %1749 = vmatprep.subr.bf16.mxu1 %v1707_v3  ;;  %1781 = vmatprep.mubr.bf16.mxu1 %v1707_v3  ;;  %v1691_v50 = vand.u32 2147483647, %v1687_v31 }
 0x50d   : > { %1750 = vmatpush1.bf16.xpose.msra.mxu1 %v1706_v57 }
 0x50e   : > { %v1693_v53 = vadd.f32 %v1692_v61, %v1690_v56 }
 0x510   : > { %1741 = vmatmul.mubr.bf16.vlgmr.msra.gmra.mrb[20].mxu0 %v1704_v7  ;;  %v1694_v28 = vadd.f32 %v1693_v53, %v1691_v50 }
 0x512   : > { %1695 = vadd.xlane.f32.xlu0 %v1694_v28 }
 0x514   : > { %1782 = vmatmul.mubr.bf16.vlgmr.msra.gmra.mrb[20].mxu1 %v1706_v57 }
 0x59f   : > { %v1696_v38 = vpop.xlane.xlu0 %1695 }
 0x5a0   : > { %v1697_v47 = vrot.slane %v1696_v38, 4 }
 0x5a2   : > { %v1698_v35 = vadd.f32 %v1697_v47, %v1696_v38 }
 0x5a4   : > { %v1699_v42 = vrot.slane %v1698_v35, 2 }
 0x5a6   : > { %v1700_v54 = vadd.f32 %v1699_v42, %v1698_v35 }
 0x5a8   : > { %v1701_v16 = vrot.slane %v1700_v54, 1 }
 0x5aa   : > { %v1702_v18 = vadd.f32 %v1701_v16, %v1700_v54 }
 0x5ac   : > { %1921 = vpush %v1702_v18 }
 0x5dd   : > { %s1922_s22 = spop %1921 }
 0x5de   : > { %v1818_v1 = vstv %s1922_s22 }
 0x5df   : > { %v1819_v55 = vsel %vm1817_vm15, %v1818_v1, %v1816_v5 }
 0x5e0   : > { %v1822_v0 = vsel %vm1820_vm0, %v1821_v8, %v1819_v55 }
 0x5e1   : > { %v1825_v29 = vsel %vm1823_vm1, %v1824_v25, %v1822_v0 }
 0x5e3   : > { %v1742_v40 = vpop.f32.mrb[20].mxu0 }
 0x5e4   : > { %v1744_v51 = vpop.f32.mrb[21].mxu0 }
 0x5e5   : > { %v1745_v2 = vpop.f32.mrb[22].mxu0 }
 0x5e6   : > { %v1747_v23 = vpop.f32.mrb[23].mxu0 }
 0x5e7   : > { %v1783_v48 = vpop.f32.mrb[20].mxu1 }
 0x5e8   : > { %v1790_v36 = vsub.f32 %v1742_v40, %v1783_v48  ;;  %v1785_v19 = vpop.f32.mrb[21].mxu1 }
 0x5e9   : > { %v1786_v11 = vpop.f32.mrb[22].mxu1 }
 0x5ea   : > { %v1792_v43 = vand.u32 2147483647, %v1790_v36  ;;  %v1791_v30 = vsub.f32 %v1745_v2, %v1786_v11  ;;  %v1788_v44 = vpop.f32.mrb[23].mxu1 }
 0x5ec   : > { %v1793_v20 = vand.u32 2147483647, %v1791_v30  ;;  %v1794_v60 = vsel %vm1268_vm10, %v1792_v43, 0.0 }
 0x5ee   : > { %v1795_v62 = vsel %vm1268_vm10, %v1793_v20, 0.0 }
 0x5ef   : > { %v1796_v34 = vadd.f32 %v1795_v62, %v1794_v60 }
 0x5f1   : > { %1797 = vadd.xlane.f32.xlu1 %v1796_v34 }
 0x67e   : > { %v1798_v59 = vpop.xlane.xlu1 %1797 }
 0x67f   : > { %v1799_v46 = vrot.slane %v1798_v59, 4 }
 0x681   : > { %v1800_v6 = vadd.f32 %v1799_v46, %v1798_v59 }
 0x683   : > { %v1801_v4 = vrot.slane %v1800_v6, 2 }
 0x685   : > { %v1802_v49 = vadd.f32 %v1801_v4, %v1800_v6 }
 0x687   : > { %v1803_v37 = vrot.slane %v1802_v49, 1 }
 0x689   : > { %v1804_v45 = vadd.f32 %v1803_v37, %v1802_v49 }
 0x68b   : > { %1923 = vpush %v1804_v45 }
 0x6bc   : > { %s1924_s13 = spop %1923 }
 0x6bd   : > { %v1827_v7 = vstv %s1924_s13 }
 0x6be   : > { %v1828_v33 = vsel %vm1826_vm2, %v1827_v7, %v1825_v29 }
 0x6bf   : > { %1829 = vst [vmem:[%s303_s12] sm:$0xff] %v1828_v33 }
 0x6c0 PF: > { %s18_s27 = sadd.s32 1, %s1954_s27  }
 0x6c1   : > { %p15_p4 = scmp.ge.s32.totalorder %s18_s27, 4  }
 0x6c3   :  { %17 = sbr.rel (!%p15_p4) target bundleno = 1 (0x1), region = 89 }

</bundles_post_ra>
